<compile_context>
chip_gen: v6e
topology: v6e:2x2x1
jax: 0.10.0
libtpu: 0.0.40
codegen_flags: <defaults>
</compile_context>

<pallas_src>
import functools
import math

import jax
import jax.numpy as jnp
from jax import lax
from jax.experimental import pallas as pl
from jax.experimental.pallas import tpu as pltpu


def _layer_norm(x, eps=1e-5):
    """LayerNorm over the last dim, no affine params (matches torch eps=1e-5)."""
    mu = jnp.mean(x, axis=-1, keepdims=True)
    xc = x - mu
    var = jnp.mean(xc * xc, axis=-1, keepdims=True)
    return xc * lax.rsqrt(var + eps)


def _encoder_layer_kernel(num_heads,
                          x_ref, mask_ref,
                          c0_ref, c1_ref, c2_ref, c3_ref,
                          wqkv_ref, bqkv_ref, wo_ref, bo_ref,
                          w1_ref, b1_ref, w2_ref, b2_ref,
                          o_ref):
    S, E = x_ref.shape                       # batch dim squeezed by BlockSpec
    H = num_heads
    Dh = E // H
    scale = 1.0 / math.sqrt(Dh)

    x = x_ref[...]                           # (S, E)  f32
    c0 = c0_ref[...]                         # (1, E)
    c1 = c1_ref[...]                         # (1, E)
    c2 = c2_ref[...]                         # (1, E)
    c3 = c3_ref[...]                         # (1, FF)
    mask_bias = mask_ref[...]                # (1, S)  additive 0 / -1e30

    # ---------------- self-attention on the ctx1-scaled input ----------------
    xc1 = (x * c1).astype(jnp.bfloat16)
    qkv = jnp.dot(xc1, wqkv_ref[...], preferred_element_type=jnp.float32)
    qkv = qkv + bqkv_ref[...]                # (S, 3E) f32
    q = qkv[:, 0 * E:1 * E]
    k = qkv[:, 1 * E:2 * E]
    v = qkv[:, 2 * E:3 * E]

    wo = wo_ref[...]                         # (E, E) bf16
    # out_proj(concat_h(head_h)) == sum_h head_h @ Wo[h*Dh:(h+1)*Dh, :]
    attn = jnp.zeros((S, E), jnp.float32)
    for h in range(H):                       # static unroll, H is small
        sl = slice(h * Dh, (h + 1) * Dh)
        qh = (q[:, sl] * scale).astype(jnp.bfloat16)
        kh = k[:, sl].astype(jnp.bfloat16)
        vh = v[:, sl].astype(jnp.bfloat16)
        s = lax.dot_general(qh, kh, (((1,), (1,)), ((), ())),
                            preferred_element_type=jnp.float32)   # (S, S)
        s = s + mask_bias
        m = jnp.max(s, axis=-1, keepdims=True)
        p = jnp.exp(s - m)
        p = p / jnp.sum(p, axis=-1, keepdims=True)
        oh = jnp.dot(p.astype(jnp.bfloat16), vh,
                     preferred_element_type=jnp.float32)          # (S, Dh)
        attn = attn + jnp.dot(oh.astype(jnp.bfloat16), wo[sl, :],
                              preferred_element_type=jnp.float32)
    attn = attn + bo_ref[...]

    # ---------------- residual + layer norm 1 --------------------------------
    y = _layer_norm(x * c0 + attn)

    # ---------------- feed-forward on ctx2 / ctx3-scaled activations ---------
    h1 = jnp.dot((y * c2).astype(jnp.bfloat16), w1_ref[...],
                 preferred_element_type=jnp.float32) + b1_ref[...]
    h1 = jnp.maximum(h1, 0.0)                # ReLU (F.relu activation)
    ff = jnp.dot((h1 * c3).astype(jnp.bfloat16), w2_ref[...],
                 preferred_element_type=jnp.float32) + b2_ref[...]

    # ---------------- residual + layer norm 2 --------------------------------
    o_ref[...] = _layer_norm(y + ff).astype(o_ref.dtype)


def transformer_encoder_layer_psp(x, key_padding_mask, contexts, params, *,
                                  num_heads):
    """Fused PSP transformer-encoder-layer forward.

    x                : (B, S, E) float32, batch_first layout
    key_padding_mask : (B, S) bool, True = padded key (or None)
    contexts         : (c0, c1, c2, c3) gain vectors of sizes (E, E, E, FF)
                       (the diagonals of the PSP context matrices)
    params           : dict of weights stored (in_features, out_features):
                       wqkv (E,3E), bqkv (3E,), wo (E,E), bo (E,),
                       w1 (E,FF), b1 (FF,), w2 (FF,E), b2 (E,)
    """
    B, S, E = x.shape
    FF = params["w1"].shape[1]
    assert E % num_heads == 0

    c0, c1, c2, c3 = contexts
    c0 = c0.reshape(1, E).astype(jnp.float32)
    c1 = c1.reshape(1, E).astype(jnp.float32)
    c2 = c2.reshape(1, E).astype(jnp.float32)
    c3 = c3.reshape(1, FF).astype(jnp.float32)

    if key_padding_mask is None:
        mask_bias = jnp.zeros((B, 1, S), jnp.float32)
    else:
        mask_bias = jnp.where(key_padding_mask, -1e30, 0.0)
        mask_bias = mask_bias.reshape(B, 1, S).astype(jnp.float32)

    # bf16 weights: halves the (dominant) weight DMA, native bf16 MXU path.
    wqkv = params["wqkv"].astype(jnp.bfloat16)
    wo = params["wo"].astype(jnp.bfloat16)
    w1 = params["w1"].astype(jnp.bfloat16)
    w2 = params["w2"].astype(jnp.bfloat16)
    bqkv = params["bqkv"].reshape(1, 3 * E).astype(jnp.float32)
    bo = params["bo"].reshape(1, E).astype(jnp.float32)
    b1 = params["b1"].reshape(1, FF).astype(jnp.float32)
    b2 = params["b2"].reshape(1, E).astype(jnp.float32)

    bcast = lambda *_: (0, 0)   # weights/ctx: same block every grid step

    flops = B * (2 * S * E * 3 * E      # qkv projection
                 + 4 * S * S * E        # scores + attn @ V
                 + 2 * S * E * E        # output projection
                 + 4 * S * E * FF)      # feed-forward
    transcendentals = B * (num_heads * S * S + 2 * S)
    bytes_accessed = (2 * B * S * E * 4                      # x in + out
                      + (3 * E * E + E * E + 2 * E * FF) * 2  # bf16 weights
                      + (3 * E + E + FF + E) * 4              # f32 biases
                      + (3 * E + FF) * 4                      # contexts
                      + B * S * 4)                            # mask bias

    kernel = functools.partial(_encoder_layer_kernel, num_heads)

    return pl.pallas_call(
        kernel,
        out_shape=jax.ShapeDtypeStruct((B, S, E), jnp.float32),
        grid=(B,),
        in_specs=[
            pl.BlockSpec((None, S, E), lambda b: (b, 0, 0)),   # x (row b)
            pl.BlockSpec((None, 1, S), lambda b: (b, 0, 0)),   # mask bias
            pl.BlockSpec((1, E), bcast),                       # c0
            pl.BlockSpec((1, E), bcast),                       # c1
            pl.BlockSpec((1, E), bcast),                       # c2
            pl.BlockSpec((1, FF), bcast),                      # c3
            pl.BlockSpec((E, 3 * E), bcast),                   # wqkv
            pl.BlockSpec((1, 3 * E), bcast),                   # bqkv
            pl.BlockSpec((E, E), bcast),                       # wo
            pl.BlockSpec((1, E), bcast),                       # bo
            pl.BlockSpec((E, FF), bcast),                      # w1
            pl.BlockSpec((1, FF), bcast),                      # b1
            pl.BlockSpec((FF, E), bcast),                      # w2
            pl.BlockSpec((1, E), bcast),                       # b2
        ],
        out_specs=pl.BlockSpec((None, S, E), lambda b: (b, 0, 0)),
        compiler_params=pltpu.CompilerParams(
            dimension_semantics=("parallel",)),
        cost_estimate=pl.CostEstimate(
            flops=int(flops),
            transcendentals=int(transcendentals),
            bytes_accessed=int(bytes_accessed)),
    )(x.astype(jnp.float32), mask_bias, c0, c1, c2, c3,
      wqkv, bqkv, wo, bo, w1, b1, w2, b2)


def reference_forward(x, key_padding_mask, contexts, params, *, num_heads):
    """Plain-JAX reference with the same bf16-operand / f32-accumulate matmul
    precision as the kernel (PyTorch module math, dropout = 0)."""
    B, S, E = x.shape
    H = num_heads
    Dh = E // H
    c0, c1, c2, c3 = [c.astype(jnp.float32) for c in contexts]

    bf = lambda a: a.astype(jnp.bfloat16)
    mm = lambda a, w: jnp.dot(bf(a), bf(w), preferred_element_type=jnp.float32)

    mask_bias = jnp.where(key_padding_mask, -1e30, 0.0).astype(jnp.float32)

    # self-attention block on ctx1-scaled input
    qkv = mm(x * c1, params["wqkv"]) + params["bqkv"]          # (B, S, 3E)
    q, k, v = qkv[..., :E], qkv[..., E:2 * E], qkv[..., 2 * E:]
    q = q.reshape(B, S, H, Dh).transpose(0, 2, 1, 3) * (1.0 / math.sqrt(Dh))
    k = k.reshape(B, S, H, Dh).transpose(0, 2, 1, 3)
    v = v.reshape(B, S, H, Dh).transpose(0, 2, 1, 3)
    s = jnp.einsum("bhqd,bhkd->bhqk", bf(q), bf(k),
                   preferred_element_type=jnp.float32)
    s = s + mask_bias[:, None, None, :]
    p = jax.nn.softmax(s, axis=-1)
    o = jnp.einsum("bhqk,bhkd->bhqd", bf(p), bf(v),
                   preferred_element_type=jnp.float32)
    o = o.transpose(0, 2, 1, 3).reshape(B, S, E)
    attn = mm(o, params["wo"]) + params["bo"]

    y = _layer_norm(x * c0 + attn)

    h1 = jnp.maximum(mm(y * c2, params["w1"]) + params["b1"], 0.0)
    ff = mm(h1 * c3, params["w2"]) + params["b2"]
    return _layer_norm(y + ff)


def init_params(key, E, FF):
    """torch.nn.Linear-style U(-1/sqrt(fan_in), 1/sqrt(fan_in)); stored (in, out)."""
    ks = jax.random.split(key, 8)

    def u(k, shape, fan_in):
        b = 1.0 / math.sqrt(fan_in)
        return jax.random.uniform(k, shape, jnp.float32, -b, b)

    return dict(
        wqkv=u(ks[0], (E, 3 * E), E), bqkv=u(ks[1], (3 * E,), E),
        wo=u(ks[2], (E, E), E),       bo=u(ks[3], (E,), E),
        w1=u(ks[4], (E, FF), E),      b1=u(ks[5], (FF,), E),
        w2=u(ks[6], (FF, E), FF),     b2=u(ks[7], (E,), FF),
    )


if __name__ == "__main__":
    # Small, lane-aligned shapes consistent with the module:
    # batch=2, seq=16, input_size(E)=128, num_heads=4, dim_feedforward=256.
    B, S, E, H, FF = 2, 16, 128, 4, 256

    key = jax.random.PRNGKey(0)
    kx, kp, k0, k1, k2, k3 = jax.random.split(key, 6)

    x = jax.random.normal(kx, (B, S, E), jnp.float32)
    # last two positions of every sequence are padding keys
    key_padding_mask = jnp.zeros((B, S), jnp.bool_).at[:, S - 2:].set(True)

    # PSP task-context diagonal gains (diag(c) matmul == elementwise scale)
    contexts = (
        1.0 + 0.1 * jax.random.normal(k0, (E,), jnp.float32),   # contexts[task][0]
        1.0 + 0.1 * jax.random.normal(k1, (E,), jnp.float32),   # contexts[task][1]
        1.0 + 0.1 * jax.random.normal(k2, (E,), jnp.float32),   # contexts[task][2]
        1.0 + 0.1 * jax.random.normal(k3, (FF,), jnp.float32),  # contexts[task][3]
    )
    params = init_params(kp, E, FF)

    # TODO(synk): src_mask is accepted by the PyTorch forward but never used
    # (only key_padding_mask reaches attention), so it is not an input here.
    out = transformer_encoder_layer_psp(x, key_padding_mask, contexts, params,
                                        num_heads=H)
    out = jax.block_until_ready(out)

    ref = reference_forward(x, key_padding_mask, contexts, params, num_heads=H)
    assert out.shape == (B, S, E)
    max_err = float(jnp.max(jnp.abs(out - ref)))
    assert jnp.allclose(out, ref, atol=2e-3, rtol=2e-3), f"max abs err {max_err}"

    print("KERNEL_OK")
</pallas_src>

<mosaic_0001>
module attributes {stable_mosaic.version = 11 : i64} {
  func.func @_encoder_layer_kernel(%arg0: i32, %arg1: memref<1x16x128xf32, #tpu.memory_space<vmem>>, %arg2: memref<1x1x16xf32, #tpu.memory_space<vmem>>, %arg3: memref<1x128xf32, #tpu.memory_space<vmem>>, %arg4: memref<1x128xf32, #tpu.memory_space<vmem>>, %arg5: memref<1x128xf32, #tpu.memory_space<vmem>>, %arg6: memref<1x256xf32, #tpu.memory_space<vmem>>, %arg7: memref<128x384xbf16, #tpu.memory_space<vmem>>, %arg8: memref<1x384xf32, #tpu.memory_space<vmem>>, %arg9: memref<128x128xbf16, #tpu.memory_space<vmem>>, %arg10: memref<1x128xf32, #tpu.memory_space<vmem>>, %arg11: memref<128x256xbf16, #tpu.memory_space<vmem>>, %arg12: memref<1x256xf32, #tpu.memory_space<vmem>>, %arg13: memref<256x128xbf16, #tpu.memory_space<vmem>>, %arg14: memref<1x128xf32, #tpu.memory_space<vmem>>, %arg15: memref<1x16x128xf32, #tpu.memory_space<vmem>>) attributes {dimension_semantics = [#tpu.dimension_semantics<parallel>], iteration_bounds = array<i64: 2>, scalar_prefetch = 0 : i64, scratch_operands = 0 : i64, tpu.core_type = #tpu.core_type<tc>, window_params = [{transform_indices = @transform_0, window_bounds = array<i64: 1, 16, 128>}, {transform_indices = @transform_1, window_bounds = array<i64: 1, 1, 16>}, {pipeline_mode = #tpu.pipeline_mode<synchronous>, transform_indices = @transform_2, window_bounds = array<i64: 1, 128>}, {pipeline_mode = #tpu.pipeline_mode<synchronous>, transform_indices = @transform_3, window_bounds = array<i64: 1, 128>}, {pipeline_mode = #tpu.pipeline_mode<synchronous>, transform_indices = @transform_4, window_bounds = array<i64: 1, 128>}, {pipeline_mode = #tpu.pipeline_mode<synchronous>, transform_indices = @transform_5, window_bounds = array<i64: 1, 256>}, {pipeline_mode = #tpu.pipeline_mode<synchronous>, transform_indices = @transform_6, window_bounds = array<i64: 128, 384>}, {pipeline_mode = #tpu.pipeline_mode<synchronous>, transform_indices = @transform_7, window_bounds = array<i64: 1, 384>}, {pipeline_mode = #tpu.pipeline_mode<synchronous>, transform_indices = @transform_8, window_bounds = array<i64: 128, 128>}, {pipeline_mode = #tpu.pipeline_mode<synchronous>, transform_indices = @transform_9, window_bounds = array<i64: 1, 128>}, {pipeline_mode = #tpu.pipeline_mode<synchronous>, transform_indices = @transform_10, window_bounds = array<i64: 128, 256>}, {pipeline_mode = #tpu.pipeline_mode<synchronous>, transform_indices = @transform_11, window_bounds = array<i64: 1, 256>}, {pipeline_mode = #tpu.pipeline_mode<synchronous>, transform_indices = @transform_12, window_bounds = array<i64: 256, 128>}, {pipeline_mode = #tpu.pipeline_mode<synchronous>, transform_indices = @transform_13, window_bounds = array<i64: 1, 128>}, {transform_indices = @transform_14, window_bounds = array<i64: 1, 16, 128>}]} {
    %c0 = arith.constant 0 : index
    %c0_0 = arith.constant 0 : index
    %c0_1 = arith.constant 0 : index
    %0 = vector.load %arg1[%c0, %c0_0, %c0_1] : memref<1x16x128xf32, #tpu.memory_space<vmem>>, vector<1x16x128xf32>
    %1 = vector.shape_cast %0 : vector<1x16x128xf32> to vector<16x128xf32>
    %c0_2 = arith.constant 0 : index
    %c0_3 = arith.constant 0 : index
    %2 = vector.load %arg3[%c0_2, %c0_3] : memref<1x128xf32, #tpu.memory_space<vmem>>, vector<1x128xf32>
    %c0_4 = arith.constant 0 : index
    %c0_5 = arith.constant 0 : index
    %3 = vector.load %arg4[%c0_4, %c0_5] : memref<1x128xf32, #tpu.memory_space<vmem>>, vector<1x128xf32>
    %c0_6 = arith.constant 0 : index
    %c0_7 = arith.constant 0 : index
    %4 = vector.load %arg5[%c0_6, %c0_7] : memref<1x128xf32, #tpu.memory_space<vmem>>, vector<1x128xf32>
    %c0_8 = arith.constant 0 : index
    %c0_9 = arith.constant 0 : index
    %5 = vector.load %arg6[%c0_8, %c0_9] : memref<1x256xf32, #tpu.memory_space<vmem>>, vector<1x256xf32>
    %c0_10 = arith.constant 0 : index
    %c0_11 = arith.constant 0 : index
    %c0_12 = arith.constant 0 : index
    %6 = vector.load %arg2[%c0_10, %c0_11, %c0_12] : memref<1x1x16xf32, #tpu.memory_space<vmem>>, vector<1x1x16xf32>
    %7 = vector.shape_cast %6 : vector<1x1x16xf32> to vector<1x16xf32>
    %8 = vector.broadcast %3 : vector<1x128xf32> to vector<16x128xf32>
    %9 = arith.mulf %1, %8 : vector<16x128xf32>
    %10 = arith.truncf %9 : vector<16x128xf32> to vector<16x128xbf16>
    %c0_13 = arith.constant 0 : index
    %c0_14 = arith.constant 0 : index
    %11 = vector.load %arg7[%c0_13, %c0_14] : memref<128x384xbf16, #tpu.memory_space<vmem>>, vector<128x384xbf16>
    %cst = arith.constant dense<0.000000e+00> : vector<16x384xf32>
    %12 = tpu.matmul %10, %11, %cst {dimension_numbers = #tpu.dot_dimension_numbers<[1], [0], [0], [1], [0, 0, 1, 1], [], []>} : vector<16x128xbf16>, vector<128x384xbf16>, vector<16x384xf32> -> vector<16x384xf32>
    %c0_15 = arith.constant 0 : index
    %c0_16 = arith.constant 0 : index
    %13 = vector.load %arg8[%c0_15, %c0_16] : memref<1x384xf32, #tpu.memory_space<vmem>>, vector<1x384xf32>
    %14 = vector.broadcast %13 : vector<1x384xf32> to vector<16x384xf32>
    %15 = arith.addf %12, %14 : vector<16x384xf32>
    %16 = vector.extract_strided_slice %15 {offsets = [0, 0], sizes = [16, 128], strides = [1, 1]} : vector<16x384xf32> to vector<16x128xf32>
    %17 = vector.extract_strided_slice %15 {offsets = [0, 128], sizes = [16, 128], strides = [1, 1]} : vector<16x384xf32> to vector<16x128xf32>
    %18 = vector.extract_strided_slice %15 {offsets = [0, 256], sizes = [16, 128], strides = [1, 1]} : vector<16x384xf32> to vector<16x128xf32>
    %c0_17 = arith.constant 0 : index
    %c0_18 = arith.constant 0 : index
    %19 = vector.load %arg9[%c0_17, %c0_18] : memref<128x128xbf16, #tpu.memory_space<vmem>>, vector<128x128xbf16>
    %cst_19 = arith.constant 0.000000e+00 : f32
    %20 = vector.broadcast %cst_19 : f32 to vector<16x128xf32>
    %21 = vector.extract_strided_slice %16 {offsets = [0, 0], sizes = [16, 32], strides = [1, 1]} : vector<16x128xf32> to vector<16x32xf32>
    %cst_20 = arith.constant 0.176776692 : f32
    %22 = vector.broadcast %cst_20 : f32 to vector<16x32xf32>
    %23 = arith.mulf %21, %22 : vector<16x32xf32>
    %24 = arith.truncf %23 : vector<16x32xf32> to vector<16x32xbf16>
    %25 = vector.extract_strided_slice %17 {offsets = [0, 0], sizes = [16, 32], strides = [1, 1]} : vector<16x128xf32> to vector<16x32xf32>
    %26 = arith.truncf %25 : vector<16x32xf32> to vector<16x32xbf16>
    %27 = vector.extract_strided_slice %18 {offsets = [0, 0], sizes = [16, 32], strides = [1, 1]} : vector<16x128xf32> to vector<16x32xf32>
    %28 = arith.truncf %27 : vector<16x32xf32> to vector<16x32xbf16>
    %cst_21 = arith.constant dense<0.000000e+00> : vector<16x16xf32>
    %29 = tpu.matmul %24, %26, %cst_21 {dimension_numbers = #tpu.dot_dimension_numbers<[1], [1], [0], [0], [0, 0, 1, 0], [], []>} : vector<16x32xbf16>, vector<16x32xbf16>, vector<16x16xf32> -> vector<16x16xf32>
    %30 = vector.broadcast %7 : vector<1x16xf32> to vector<16x16xf32>
    %31 = arith.addf %29, %30 : vector<16x16xf32>
    %cst_22 = arith.constant dense<0xFF800000> : vector<16xf32>
    %32 = vector.multi_reduction <maximumf>, %31, %cst_22 [1] : vector<16x16xf32> to vector<16xf32>
    %33 = vector.shape_cast %32 : vector<16xf32> to vector<16x1xf32>
    %34 = vector.broadcast %33 : vector<16x1xf32> to vector<16x16xf32>
    %35 = arith.subf %31, %34 : vector<16x16xf32>
    %36 = math.exp %35 : vector<16x16xf32>
    %cst_23 = arith.constant dense<0.000000e+00> : vector<16xf32>
    %37 = vector.multi_reduction <add>, %36, %cst_23 [1] : vector<16x16xf32> to vector<16xf32>
    %38 = vector.shape_cast %37 : vector<16xf32> to vector<16x1xf32>
    %39 = vector.broadcast %38 : vector<16x1xf32> to vector<16x16xf32>
    %40 = arith.divf %36, %39 : vector<16x16xf32>
    %41 = arith.truncf %40 : vector<16x16xf32> to vector<16x16xbf16>
    %cst_24 = arith.constant dense<0.000000e+00> : vector<16x32xf32>
    %42 = tpu.matmul %41, %28, %cst_24 {dimension_numbers = #tpu.dot_dimension_numbers<[1], [0], [0], [1], [0, 0, 1, 1], [], []>} : vector<16x16xbf16>, vector<16x32xbf16>, vector<16x32xf32> -> vector<16x32xf32>
    %43 = arith.truncf %42 : vector<16x32xf32> to vector<16x32xbf16>
    %44 = vector.extract_strided_slice %19 {offsets = [0, 0], sizes = [32, 128], strides = [1, 1]} : vector<128x128xbf16> to vector<32x128xbf16>
    %cst_25 = arith.constant dense<0.000000e+00> : vector<16x128xf32>
    %45 = tpu.matmul %43, %44, %cst_25 {dimension_numbers = #tpu.dot_dimension_numbers<[1], [0], [0], [1], [0, 0, 1, 1], [], []>} : vector<16x32xbf16>, vector<32x128xbf16>, vector<16x128xf32> -> vector<16x128xf32>
    %46 = arith.addf %20, %45 : vector<16x128xf32>
    %47 = vector.extract_strided_slice %16 {offsets = [0, 32], sizes = [16, 32], strides = [1, 1]} : vector<16x128xf32> to vector<16x32xf32>
    %cst_26 = arith.constant 0.176776692 : f32
    %48 = vector.broadcast %cst_26 : f32 to vector<16x32xf32>
    %49 = arith.mulf %47, %48 : vector<16x32xf32>
    %50 = arith.truncf %49 : vector<16x32xf32> to vector<16x32xbf16>
    %51 = vector.extract_strided_slice %17 {offsets = [0, 32], sizes = [16, 32], strides = [1, 1]} : vector<16x128xf32> to vector<16x32xf32>
    %52 = arith.truncf %51 : vector<16x32xf32> to vector<16x32xbf16>
    %53 = vector.extract_strided_slice %18 {offsets = [0, 32], sizes = [16, 32], strides = [1, 1]} : vector<16x128xf32> to vector<16x32xf32>
    %54 = arith.truncf %53 : vector<16x32xf32> to vector<16x32xbf16>
    %cst_27 = arith.constant dense<0.000000e+00> : vector<16x16xf32>
    %55 = tpu.matmul %50, %52, %cst_27 {dimension_numbers = #tpu.dot_dimension_numbers<[1], [1], [0], [0], [0, 0, 1, 0], [], []>} : vector<16x32xbf16>, vector<16x32xbf16>, vector<16x16xf32> -> vector<16x16xf32>
    %56 = vector.broadcast %7 : vector<1x16xf32> to vector<16x16xf32>
    %57 = arith.addf %55, %56 : vector<16x16xf32>
    %cst_28 = arith.constant dense<0xFF800000> : vector<16xf32>
    %58 = vector.multi_reduction <maximumf>, %57, %cst_28 [1] : vector<16x16xf32> to vector<16xf32>
    %59 = vector.shape_cast %58 : vector<16xf32> to vector<16x1xf32>
    %60 = vector.broadcast %59 : vector<16x1xf32> to vector<16x16xf32>
    %61 = arith.subf %57, %60 : vector<16x16xf32>
    %62 = math.exp %61 : vector<16x16xf32>
    %cst_29 = arith.constant dense<0.000000e+00> : vector<16xf32>
    %63 = vector.multi_reduction <add>, %62, %cst_29 [1] : vector<16x16xf32> to vector<16xf32>
    %64 = vector.shape_cast %63 : vector<16xf32> to vector<16x1xf32>
    %65 = vector.broadcast %64 : vector<16x1xf32> to vector<16x16xf32>
    %66 = arith.divf %62, %65 : vector<16x16xf32>
    %67 = arith.truncf %66 : vector<16x16xf32> to vector<16x16xbf16>
    %cst_30 = arith.constant dense<0.000000e+00> : vector<16x32xf32>
    %68 = tpu.matmul %67, %54, %cst_30 {dimension_numbers = #tpu.dot_dimension_numbers<[1], [0], [0], [1], [0, 0, 1, 1], [], []>} : vector<16x16xbf16>, vector<16x32xbf16>, vector<16x32xf32> -> vector<16x32xf32>
    %69 = arith.truncf %68 : vector<16x32xf32> to vector<16x32xbf16>
    %70 = vector.extract_strided_slice %19 {offsets = [32, 0], sizes = [32, 128], strides = [1, 1]} : vector<128x128xbf16> to vector<32x128xbf16>
    %cst_31 = arith.constant dense<0.000000e+00> : vector<16x128xf32>
    %71 = tpu.matmul %69, %70, %cst_31 {dimension_numbers = #tpu.dot_dimension_numbers<[1], [0], [0], [1], [0, 0, 1, 1], [], []>} : vector<16x32xbf16>, vector<32x128xbf16>, vector<16x128xf32> -> vector<16x128xf32>
    %72 = arith.addf %46, %71 : vector<16x128xf32>
    %73 = vector.extract_strided_slice %16 {offsets = [0, 64], sizes = [16, 32], strides = [1, 1]} : vector<16x128xf32> to vector<16x32xf32>
    %cst_32 = arith.constant 0.176776692 : f32
    %74 = vector.broadcast %cst_32 : f32 to vector<16x32xf32>
    %75 = arith.mulf %73, %74 : vector<16x32xf32>
    %76 = arith.truncf %75 : vector<16x32xf32> to vector<16x32xbf16>
    %77 = vector.extract_strided_slice %17 {offsets = [0, 64], sizes = [16, 32], strides = [1, 1]} : vector<16x128xf32> to vector<16x32xf32>
    %78 = arith.truncf %77 : vector<16x32xf32> to vector<16x32xbf16>
    %79 = vector.extract_strided_slice %18 {offsets = [0, 64], sizes = [16, 32], strides = [1, 1]} : vector<16x128xf32> to vector<16x32xf32>
    %80 = arith.truncf %79 : vector<16x32xf32> to vector<16x32xbf16>
    %cst_33 = arith.constant dense<0.000000e+00> : vector<16x16xf32>
    %81 = tpu.matmul %76, %78, %cst_33 {dimension_numbers = #tpu.dot_dimension_numbers<[1], [1], [0], [0], [0, 0, 1, 0], [], []>} : vector<16x32xbf16>, vector<16x32xbf16>, vector<16x16xf32> -> vector<16x16xf32>
    %82 = vector.broadcast %7 : vector<1x16xf32> to vector<16x16xf32>
    %83 = arith.addf %81, %82 : vector<16x16xf32>
    %cst_34 = arith.constant dense<0xFF800000> : vector<16xf32>
    %84 = vector.multi_reduction <maximumf>, %83, %cst_34 [1] : vector<16x16xf32> to vector<16xf32>
    %85 = vector.shape_cast %84 : vector<16xf32> to vector<16x1xf32>
    %86 = vector.broadcast %85 : vector<16x1xf32> to vector<16x16xf32>
    %87 = arith.subf %83, %86 : vector<16x16xf32>
    %88 = math.exp %87 : vector<16x16xf32>
    %cst_35 = arith.constant dense<0.000000e+00> : vector<16xf32>
    %89 = vector.multi_reduction <add>, %88, %cst_35 [1] : vector<16x16xf32> to vector<16xf32>
    %90 = vector.shape_cast %89 : vector<16xf32> to vector<16x1xf32>
    %91 = vector.broadcast %90 : vector<16x1xf32> to vector<16x16xf32>
    %92 = arith.divf %88, %91 : vector<16x16xf32>
    %93 = arith.truncf %92 : vector<16x16xf32> to vector<16x16xbf16>
    %cst_36 = arith.constant dense<0.000000e+00> : vector<16x32xf32>
    %94 = tpu.matmul %93, %80, %cst_36 {dimension_numbers = #tpu.dot_dimension_numbers<[1], [0], [0], [1], [0, 0, 1, 1], [], []>} : vector<16x16xbf16>, vector<16x32xbf16>, vector<16x32xf32> -> vector<16x32xf32>
    %95 = arith.truncf %94 : vector<16x32xf32> to vector<16x32xbf16>
    %96 = vector.extract_strided_slice %19 {offsets = [64, 0], sizes = [32, 128], strides = [1, 1]} : vector<128x128xbf16> to vector<32x128xbf16>
    %cst_37 = arith.constant dense<0.000000e+00> : vector<16x128xf32>
    %97 = tpu.matmul %95, %96, %cst_37 {dimension_numbers = #tpu.dot_dimension_numbers<[1], [0], [0], [1], [0, 0, 1, 1], [], []>} : vector<16x32xbf16>, vector<32x128xbf16>, vector<16x128xf32> -> vector<16x128xf32>
    %98 = arith.addf %72, %97 : vector<16x128xf32>
    %99 = vector.extract_strided_slice %16 {offsets = [0, 96], sizes = [16, 32], strides = [1, 1]} : vector<16x128xf32> to vector<16x32xf32>
    %cst_38 = arith.constant 0.176776692 : f32
    %100 = vector.broadcast %cst_38 : f32 to vector<16x32xf32>
    %101 = arith.mulf %99, %100 : vector<16x32xf32>
    %102 = arith.truncf %101 : vector<16x32xf32> to vector<16x32xbf16>
    %103 = vector.extract_strided_slice %17 {offsets = [0, 96], sizes = [16, 32], strides = [1, 1]} : vector<16x128xf32> to vector<16x32xf32>
    %104 = arith.truncf %103 : vector<16x32xf32> to vector<16x32xbf16>
    %105 = vector.extract_strided_slice %18 {offsets = [0, 96], sizes = [16, 32], strides = [1, 1]} : vector<16x128xf32> to vector<16x32xf32>
    %106 = arith.truncf %105 : vector<16x32xf32> to vector<16x32xbf16>
    %cst_39 = arith.constant dense<0.000000e+00> : vector<16x16xf32>
    %107 = tpu.matmul %102, %104, %cst_39 {dimension_numbers = #tpu.dot_dimension_numbers<[1], [1], [0], [0], [0, 0, 1, 0], [], []>} : vector<16x32xbf16>, vector<16x32xbf16>, vector<16x16xf32> -> vector<16x16xf32>
    %108 = vector.broadcast %7 : vector<1x16xf32> to vector<16x16xf32>
    %109 = arith.addf %107, %108 : vector<16x16xf32>
    %cst_40 = arith.constant dense<0xFF800000> : vector<16xf32>
    %110 = vector.multi_reduction <maximumf>, %109, %cst_40 [1] : vector<16x16xf32> to vector<16xf32>
    %111 = vector.shape_cast %110 : vector<16xf32> to vector<16x1xf32>
    %112 = vector.broadcast %111 : vector<16x1xf32> to vector<16x16xf32>
    %113 = arith.subf %109, %112 : vector<16x16xf32>
    %114 = math.exp %113 : vector<16x16xf32>
    %cst_41 = arith.constant dense<0.000000e+00> : vector<16xf32>
    %115 = vector.multi_reduction <add>, %114, %cst_41 [1] : vector<16x16xf32> to vector<16xf32>
    %116 = vector.shape_cast %115 : vector<16xf32> to vector<16x1xf32>
    %117 = vector.broadcast %116 : vector<16x1xf32> to vector<16x16xf32>
    %118 = arith.divf %114, %117 : vector<16x16xf32>
    %119 = arith.truncf %118 : vector<16x16xf32> to vector<16x16xbf16>
    %cst_42 = arith.constant dense<0.000000e+00> : vector<16x32xf32>
    %120 = tpu.matmul %119, %106, %cst_42 {dimension_numbers = #tpu.dot_dimension_numbers<[1], [0], [0], [1], [0, 0, 1, 1], [], []>} : vector<16x16xbf16>, vector<16x32xbf16>, vector<16x32xf32> -> vector<16x32xf32>
    %121 = arith.truncf %120 : vector<16x32xf32> to vector<16x32xbf16>
    %122 = vector.extract_strided_slice %19 {offsets = [96, 0], sizes = [32, 128], strides = [1, 1]} : vector<128x128xbf16> to vector<32x128xbf16>
    %cst_43 = arith.constant dense<0.000000e+00> : vector<16x128xf32>
    %123 = tpu.matmul %121, %122, %cst_43 {dimension_numbers = #tpu.dot_dimension_numbers<[1], [0], [0], [1], [0, 0, 1, 1], [], []>} : vector<16x32xbf16>, vector<32x128xbf16>, vector<16x128xf32> -> vector<16x128xf32>
    %124 = arith.addf %98, %123 : vector<16x128xf32>
    %c0_44 = arith.constant 0 : index
    %c0_45 = arith.constant 0 : index
    %125 = vector.load %arg10[%c0_44, %c0_45] : memref<1x128xf32, #tpu.memory_space<vmem>>, vector<1x128xf32>
    %126 = vector.broadcast %125 : vector<1x128xf32> to vector<16x128xf32>
    %127 = arith.addf %124, %126 : vector<16x128xf32>
    %128 = vector.broadcast %2 : vector<1x128xf32> to vector<16x128xf32>
    %129 = arith.mulf %1, %128 : vector<16x128xf32>
    %130 = arith.addf %129, %127 : vector<16x128xf32>
    %cst_46 = arith.constant dense<0.000000e+00> : vector<16xf32>
    %131 = vector.multi_reduction <add>, %130, %cst_46 [1] : vector<16x128xf32> to vector<16xf32>
    %132 = vector.shape_cast %131 : vector<16xf32> to vector<16x1xf32>
    %cst_47 = arith.constant 1.280000e+02 : f32
    %133 = vector.broadcast %cst_47 : f32 to vector<16x1xf32>
    %134 = arith.divf %132, %133 : vector<16x1xf32>
    %135 = vector.broadcast %134 : vector<16x1xf32> to vector<16x128xf32>
    %136 = arith.subf %130, %135 : vector<16x128xf32>
    %137 = arith.mulf %136, %136 : vector<16x128xf32>
    %cst_48 = arith.constant dense<0.000000e+00> : vector<16xf32>
    %138 = vector.multi_reduction <add>, %137, %cst_48 [1] : vector<16x128xf32> to vector<16xf32>
    %139 = vector.shape_cast %138 : vector<16xf32> to vector<16x1xf32>
    %cst_49 = arith.constant 1.280000e+02 : f32
    %140 = vector.broadcast %cst_49 : f32 to vector<16x1xf32>
    %141 = arith.divf %139, %140 : vector<16x1xf32>
    %cst_50 = arith.constant 9.99999974E-6 : f32
    %142 = vector.broadcast %cst_50 : f32 to vector<16x1xf32>
    %143 = arith.addf %141, %142 : vector<16x1xf32>
    %144 = math.rsqrt %143 : vector<16x1xf32>
    %145 = vector.broadcast %144 : vector<16x1xf32> to vector<16x128xf32>
    %146 = arith.mulf %136, %145 : vector<16x128xf32>
    %147 = vector.broadcast %4 : vector<1x128xf32> to vector<16x128xf32>
    %148 = arith.mulf %146, %147 : vector<16x128xf32>
    %149 = arith.truncf %148 : vector<16x128xf32> to vector<16x128xbf16>
    %c0_51 = arith.constant 0 : index
    %c0_52 = arith.constant 0 : index
    %150 = vector.load %arg11[%c0_51, %c0_52] : memref<128x256xbf16, #tpu.memory_space<vmem>>, vector<128x256xbf16>
    %cst_53 = arith.constant dense<0.000000e+00> : vector<16x256xf32>
    %151 = tpu.matmul %149, %150, %cst_53 {dimension_numbers = #tpu.dot_dimension_numbers<[1], [0], [0], [1], [0, 0, 1, 1], [], []>} : vector<16x128xbf16>, vector<128x256xbf16>, vector<16x256xf32> -> vector<16x256xf32>
    %c0_54 = arith.constant 0 : index
    %c0_55 = arith.constant 0 : index
    %152 = vector.load %arg12[%c0_54, %c0_55] : memref<1x256xf32, #tpu.memory_space<vmem>>, vector<1x256xf32>
    %153 = vector.broadcast %152 : vector<1x256xf32> to vector<16x256xf32>
    %154 = arith.addf %151, %153 : vector<16x256xf32>
    %cst_56 = arith.constant 0.000000e+00 : f32
    %155 = vector.broadcast %cst_56 : f32 to vector<16x256xf32>
    %156 = arith.maximumf %154, %155 : vector<16x256xf32>
    %157 = vector.broadcast %5 : vector<1x256xf32> to vector<16x256xf32>
    %158 = arith.mulf %156, %157 : vector<16x256xf32>
    %159 = arith.truncf %158 : vector<16x256xf32> to vector<16x256xbf16>
    %c0_57 = arith.constant 0 : index
    %c0_58 = arith.constant 0 : index
    %160 = vector.load %arg13[%c0_57, %c0_58] : memref<256x128xbf16, #tpu.memory_space<vmem>>, vector<256x128xbf16>
    %cst_59 = arith.constant dense<0.000000e+00> : vector<16x128xf32>
    %161 = tpu.matmul %159, %160, %cst_59 {dimension_numbers = #tpu.dot_dimension_numbers<[1], [0], [0], [1], [0, 0, 1, 1], [], []>} : vector<16x256xbf16>, vector<256x128xbf16>, vector<16x128xf32> -> vector<16x128xf32>
    %c0_60 = arith.constant 0 : index
    %c0_61 = arith.constant 0 : index
    %162 = vector.load %arg14[%c0_60, %c0_61] : memref<1x128xf32, #tpu.memory_space<vmem>>, vector<1x128xf32>
    %163 = vector.broadcast %162 : vector<1x128xf32> to vector<16x128xf32>
    %164 = arith.addf %161, %163 : vector<16x128xf32>
    %165 = arith.addf %146, %164 : vector<16x128xf32>
    %cst_62 = arith.constant dense<0.000000e+00> : vector<16xf32>
    %166 = vector.multi_reduction <add>, %165, %cst_62 [1] : vector<16x128xf32> to vector<16xf32>
    %167 = vector.shape_cast %166 : vector<16xf32> to vector<16x1xf32>
    %cst_63 = arith.constant 1.280000e+02 : f32
    %168 = vector.broadcast %cst_63 : f32 to vector<16x1xf32>
    %169 = arith.divf %167, %168 : vector<16x1xf32>
    %170 = vector.broadcast %169 : vector<16x1xf32> to vector<16x128xf32>
    %171 = arith.subf %165, %170 : vector<16x128xf32>
    %172 = arith.mulf %171, %171 : vector<16x128xf32>
    %cst_64 = arith.constant dense<0.000000e+00> : vector<16xf32>
    %173 = vector.multi_reduction <add>, %172, %cst_64 [1] : vector<16x128xf32> to vector<16xf32>
    %174 = vector.shape_cast %173 : vector<16xf32> to vector<16x1xf32>
    %cst_65 = arith.constant 1.280000e+02 : f32
    %175 = vector.broadcast %cst_65 : f32 to vector<16x1xf32>
    %176 = arith.divf %174, %175 : vector<16x1xf32>
    %cst_66 = arith.constant 9.99999974E-6 : f32
    %177 = vector.broadcast %cst_66 : f32 to vector<16x1xf32>
    %178 = arith.addf %176, %177 : vector<16x1xf32>
    %179 = math.rsqrt %178 : vector<16x1xf32>
    %180 = vector.broadcast %179 : vector<16x1xf32> to vector<16x128xf32>
    %181 = arith.mulf %171, %180 : vector<16x128xf32>
    %c0_67 = arith.constant 0 : index
    %c0_68 = arith.constant 0 : index
    %c0_69 = arith.constant 0 : index
    %182 = vector.load %arg15[%c0_67, %c0_68, %c0_69] : memref<1x16x128xf32, #tpu.memory_space<vmem>>, vector<1x16x128xf32>
    %183 = vector.shape_cast %182 : vector<1x16x128xf32> to vector<16x128xf32>
    %184 = vector.shape_cast %181 : vector<16x128xf32> to vector<1x16x128xf32>
    tpu.vector_store %arg15[%c0_67, %c0_68, %c0_69], %184 {strides = array<i32>} : memref<1x16x128xf32, #tpu.memory_space<vmem>>, vector<1x16x128xf32>,
    return
  }
  func.func @transform_0(%arg0: i32) -> (i32, i32, i32) {
    %c0_i32 = arith.constant 0 : i32
    %c0_i32_0 = arith.constant 0 : i32
    %c0_i32_1 = arith.constant 0 : i32
    return %arg0, %c0_i32, %c0_i32_0 : i32, i32, i32
  }
  func.func @transform_1(%arg0: i32) -> (i32, i32, i32) {
    %c0_i32 = arith.constant 0 : i32
    %c0_i32_0 = arith.constant 0 : i32
    %c0_i32_1 = arith.constant 0 : i32
    return %arg0, %c0_i32, %c0_i32_0 : i32, i32, i32
  }
  func.func @transform_2(%arg0: i32) -> (i32, i32) {
    %c0_i32 = arith.constant 0 : i32
    %c0_i32_0 = arith.constant 0 : i32
    %c0_i32_1 = arith.constant 0 : i32
    return %c0_i32, %c0_i32_0 : i32, i32
  }
  func.func @transform_3(%arg0: i32) -> (i32, i32) {
    %c0_i32 = arith.constant 0 : i32
    %c0_i32_0 = arith.constant 0 : i32
    %c0_i32_1 = arith.constant 0 : i32
    return %c0_i32, %c0_i32_0 : i32, i32
  }
  func.func @transform_4(%arg0: i32) -> (i32, i32) {
    %c0_i32 = arith.constant 0 : i32
    %c0_i32_0 = arith.constant 0 : i32
    %c0_i32_1 = arith.constant 0 : i32
    return %c0_i32, %c0_i32_0 : i32, i32
  }
  func.func @transform_5(%arg0: i32) -> (i32, i32) {
    %c0_i32 = arith.constant 0 : i32
    %c0_i32_0 = arith.constant 0 : i32
    %c0_i32_1 = arith.constant 0 : i32
    return %c0_i32, %c0_i32_0 : i32, i32
  }
  func.func @transform_6(%arg0: i32) -> (i32, i32) {
    %c0_i32 = arith.constant 0 : i32
    %c0_i32_0 = arith.constant 0 : i32
    %c0_i32_1 = arith.constant 0 : i32
    return %c0_i32, %c0_i32_0 : i32, i32
  }
  func.func @transform_7(%arg0: i32) -> (i32, i32) {
    %c0_i32 = arith.constant 0 : i32
    %c0_i32_0 = arith.constant 0 : i32
    %c0_i32_1 = arith.constant 0 : i32
    return %c0_i32, %c0_i32_0 : i32, i32
  }
  func.func @transform_8(%arg0: i32) -> (i32, i32) {
    %c0_i32 = arith.constant 0 : i32
    %c0_i32_0 = arith.constant 0 : i32
    %c0_i32_1 = arith.constant 0 : i32
    return %c0_i32, %c0_i32_0 : i32, i32
  }
  func.func @transform_9(%arg0: i32) -> (i32, i32) {
    %c0_i32 = arith.constant 0 : i32
    %c0_i32_0 = arith.constant 0 : i32
    %c0_i32_1 = arith.constant 0 : i32
    return %c0_i32, %c0_i32_0 : i32, i32
  }
  func.func @transform_10(%arg0: i32) -> (i32, i32) {
    %c0_i32 = arith.constant 0 : i32
    %c0_i32_0 = arith.constant 0 : i32
    %c0_i32_1 = arith.constant 0 : i32
    return %c0_i32, %c0_i32_0 : i32, i32
  }
  func.func @transform_11(%arg0: i32) -> (i32, i32) {
    %c0_i32 = arith.constant 0 : i32
    %c0_i32_0 = arith.constant 0 : i32
    %c0_i32_1 = arith.constant 0 : i32
    return %c0_i32, %c0_i32_0 : i32, i32
  }
  func.func @transform_12(%arg0: i32) -> (i32, i32) {
    %c0_i32 = arith.constant 0 : i32
    %c0_i32_0 = arith.constant 0 : i32
    %c0_i32_1 = arith.constant 0 : i32
    return %c0_i32, %c0_i32_0 : i32, i32
  }
  func.func @transform_13(%arg0: i32) -> (i32, i32) {
    %c0_i32 = arith.constant 0 : i32
    %c0_i32_0 = arith.constant 0 : i32
    %c0_i32_1 = arith.constant 0 : i32
    return %c0_i32, %c0_i32_0 : i32, i32
  }
  func.func @transform_14(%arg0: i32) -> (i32, i32, i32) {
    %c0_i32 = arith.constant 0 : i32
    %c0_i32_0 = arith.constant 0 : i32
    %c0_i32_1 = arith.constant 0 : i32
    return %arg0, %c0_i32, %c0_i32_0 : i32, i32, i32
  }
}

</mosaic_0001>

<bundles_post_ra>
// kernel: tpu_custom_call.1
= control target key start
LH: loop header
LB: loop body
LE: loop exit
PB: predicated region body
PF: predicated region fallthrough
CT: control target
= control target key end

     0   :  { %s3660_s0 = inlined_call_operand.hbm [shape: f32[2,16,128], index: 0, kind: input, shape index: {}]   ;;  %s3661_s1 = inlined_call_operand.hbm [shape: f32[2,1,16], index: 1, kind: input, shape index: {}]   ;;  %s3662_s2 = inlined_call_operand.hbm [shape: f32[1,128], index: 2, kind: input, shape index: {}]   ;;  %s3663_s3 = inlined_call_operand.hbm [shape: f32[1,128], index: 3, kind: input, shape index: {}]   ;;  %s3664_s4 = inlined_call_operand.hbm [shape: f32[1,128], index: 4, kind: input, shape index: {}]   ;;  %s3665_s5 = inlined_call_operand.vmem [shape: f32[1,256], index: 5, kind: input, shape index: {}]   ;;  %s3666_s6 = inlined_call_operand.hbm [shape: bf16[128,384], index: 6, kind: input, shape index: {}]   ;;  %s3667_s7 = inlined_call_operand.vmem [shape: f32[1,384], index: 7, kind: input, shape index: {}]   ;;  %s3668_s8 = inlined_call_operand.hbm [shape: bf16[128,128], index: 8, kind: input, shape index: {}]   ;;  %s3669_s9 = inlined_call_operand.vmem [shape: f32[1,128], index: 9, kind: input, shape index: {}]   ;;  %s3670_s10 = inlined_call_operand.hbm [shape: bf16[128,256], index: 10, kind: input, shape index: {}]   ;;  %s3671_s11 = inlined_call_operand.vmem [shape: f32[1,256], index: 11, kind: input, shape index: {}]   ;;  %s3672_s12 = inlined_call_operand.hbm [shape: bf16[256,128], index: 12, kind: input, shape index: {}]   ;;  %s3673_s13 = inlined_call_operand.vmem [shape: f32[1,128], index: 13, kind: input, shape index: {}]   ;;  %s3674_s14 = inlined_call_operand.hbm [shape: f32[2,16,128], index: 14, kind: output, shape index: {}]  }
   0x1   :  { %3683 = sst [smem:[#allocation27_spill]] %s3660_s0 }
   0x2   :  { %3684 = sst [smem:[#allocation28_spill]] %s3662_s2 }
   0x3   :  { %3685 = sst [smem:[#allocation29_spill]] %s3663_s3 }
   0x4   :  { %3686 = sst [smem:[#allocation30_spill]] %s3664_s4 }
   0x5   :  { %3687 = sst [smem:[#allocation31_spill]] %s3666_s6 }
   0x6   :  { %3688 = sst [smem:[#allocation32_spill]] %s3668_s8 }
   0x7   :  { %3689 = sst [smem:[#allocation33_spill]] %s3670_s10 }
   0x8   :  { %3690 = sst [smem:[#allocation34_spill]] %s3672_s12 }
   0x9   :  { %3691 = sst [smem:[#allocation35_spill]] %s3674_s14 }
   0xa   :  { %19 = vsyncpa [#allocation3], 0 }
   0xb   :  { %21 = vsyncpa [#allocation3 + $0x1], 0 }
   0xc   :  { %22 = vsyncpa [#allocation6], 0 }
   0xd   :  { %24 = vsyncpa [#allocation6 + $0x1], 0 }
   0xe   :  { %25 = vsyncpa [#allocation9], 0 }
   0xf   :  { %26 = vsyncpa [#allocation12], 0 }
  0x10   :  { %27 = vsyncpa [#allocation15], 0 }
  0x11   :  { %28 = vsyncpa [#allocation4], 0 }
  0x12   :  { %30 = vsyncpa [#allocation4 + $0x1], 0  ;;  %s3183_s29 = smov 0   ;;  %s3185_s30 = smov 0  }
  0x13   :  { %s3187_s15 = smov 0   ;;  %s3189_s16 = smov 0  }
  0x14 LB: > { %3692 = sst [smem:[#allocation25_spill]] %s3078_s15  ;;  %s3084_s17 = smov [#allocation7]   ;;  %s3082_s16 = sphi %s3189_s16, %s3732_s16   ;;  %s3078_s15 = sphi %s3187_s15, %s3729_s15   ;;  %s3074_s30 = sphi %s3185_s30, %s3731_s30   ;;  %s3070_s29 = sphi %s3183_s29, %s3730_s29  }
  0x15   : > { %s384_s18 = sshll.u32 %s3084_s17, 4  ;;  %s3204_s19 = sadd.s32 4294967295, %s3082_s16   ;;  %s385_s18 = int_to_ptr.vmem [resolvable:$true] %s384_s18 }
  0x16   : > { %p2233_p0 = scmp.ge.s32.totalorder %s3082_s16, 1  ;;  %p3676_p1 = scmp.eq.s32.totalorder %s3204_s19, 0 }
  0x17   : > { %p371_p2 = scmp.lt.s32.totalorder %s3082_s16, 3  ;;  %s3085_s21 = smov [#allocation8]  }
  0x18   : > { %s395_s22 = sshll.u32 %s3085_s21, 4  ;;  %s3086_s23 = smov [#allocation11]   ;;  %s396_s22 = int_to_ptr.vmem [resolvable:$true] %s395_s22 }
  0x19   : > { %p3209_p3 = pnand %p2233_p0, %p371_p2  ;;  %s419_s24 = sshll.u32 %s3086_s23, 4  ;;  %s3222_s24 = int_to_ptr.vmem [resolvable:$true] %s419_s24 }
  0x1a   : > { %s2771_s27 = scalar_lea.vmem %s385_s18, 16  ;;  %s2778_s28 = scalar_lea.vmem %s385_s18, 32 }
  0x1b   : > { %s3693_s20 = scalar_select %p3209_p3, 1, 0 }
  0x1c   : > { %p2538_p5 = pneg %p3209_p3  ;;  %p2772_p8 = scmp.ne.s32.totalorder %s385_s18, %s2771_s27 }
  0x1d   : > { %p2779_p11 = scmp.lt.s32.totalorder %s385_s18, %s385_s18  ;;  %p2780_p12 = scmp.lt.s32.totalorder %s2778_s28, %s2771_s27 }
  0x1e   : > { %p3218_p6 = pnand %p2538_p5, %p3676_p1 }
  0x1f   : > { %p2781_p13 = por %p2780_p12, %p2779_p11 }
  0x20   : > { %p3226_p7 = pneg %p3218_p6 }
  0x22   : > { %p2774_p9 = pnand %p2772_p8, %p3226_p7 }
  0x24   : > { %p2775_p10 = pneg %p2774_p9 }
  0x26   : > { %p2782_p0 = pnand %p2781_p13, %p2775_p10 }
  0x28   : > { %2785 = shalt.err (!%p2782_p0)
}
  0x29   : > { %s3696_s2 = sld [smem:[#allocation28_spill]]  ;;  %s2797_s23 = scalar_lea.vmem %s396_s22, 16 }
  0x2a   : > { %p2798_p2 = scmp.ne.s32.totalorder %s396_s22, %s2797_s23  ;;  %s2804_s14 = scalar_lea.vmem %s396_s22, 32 }
  0x2b   : > { %p2805_p8 = scmp.lt.s32.totalorder %s396_s22, %s396_s22  ;;  %p2806_p9 = scmp.lt.s32.totalorder %s2804_s14, %s2797_s23 }
  0x2c   : > { %p2800_p5 = pnand %p2798_p2, %p3226_p7 }
  0x2d   : > { %p2807_p1 = por %p2806_p9, %p2805_p8 }
  0x2e   : > { %p2801_p4 = pneg %p2800_p5 }
  0x2f   : > { %2541 = dma.hbm_to_vmem [thread:$0]  (!%p3218_p6), %s3696_s2, 16, %s385_s18, [#allocation6]  }
  0x30   : > { %p2808_p3 = pnand %p2807_p1, %p2801_p4 }
  0x32   : > { %2811 = shalt.err (!%p2808_p3)
}
  0x33   : > { %s3697_s3 = sld [smem:[#allocation29_spill]]  ;;  %s2823_s18 = scalar_lea.vmem %s3222_s24, 3072 }
  0x34   : > { %p2824_p10 = scmp.ne.s32.totalorder %s3222_s24, %s2823_s18  ;;  %p2831_p13 = scmp.lt.s32.totalorder %s3222_s24, %s3222_s24 }
  0x35   : > { %p2832_p0 = scmp.lt.s32.totalorder %s2823_s18, %s2823_s18 }
  0x36   : > { %p2826_p11 = pnand %p2824_p10, %p3226_p7 }
  0x37   : > { %p2833_p1 = por %p2832_p0, %p2831_p13 }
  0x38   : > { %p2827_p12 = pneg %p2826_p11 }
  0x39   : > { %2544 = dma.hbm_to_vmem [thread:$0]  (!%p3218_p6), %s3697_s3, 16, %s396_s22, [#allocation9]  }
  0x3a   : > { %p2834_p3 = pnand %p2833_p1, %p2827_p12 }
  0x3c   : > { %2837 = shalt.err (!%p2834_p3)
}
  0x3d   : > { %s3087_s14 = smov 192   ;;  %s3088_s17 = smov 12  }
  0x3e   : > { %s3698_s6 = sld [smem:[#allocation31_spill]]  ;;  %s3089_s22 = smov [#allocation14]  }
  0x3f   : > { %s451_s27 = sshll.u32 %s3089_s22, 4  ;;  %s452_s27 = int_to_ptr.vmem [resolvable:$true] %s451_s27 }
  0x40   : > { %s2849_s28 = scalar_lea.vmem %s452_s27, 2048  ;;  %p2857_p8 = scmp.lt.s32.totalorder %s452_s27, %s452_s27 }
  0x41   : > { %p2850_p4 = scmp.ne.s32.totalorder %s452_s27, %s2849_s28  ;;  %p2858_p9 = scmp.lt.s32.totalorder %s2849_s28, %s2849_s28 }
  0x43   : > { %p2852_p2 = pnand %p2850_p4, %p3226_p7  ;;  %p2859_p10 = por %p2858_p9, %p2857_p8 }
  0x44   : > { %2550 = dma.hbm_to_vmem [thread:$0]  (!%p3218_p6), %s3698_s6, 3072, %s3222_s24, [#allocation12], %s3087_s14, %s3087_s14, %s3088_s17  }
  0x45   : > { %p2853_p5 = pneg %p2852_p2 }
  0x47   : > { %p2860_p11 = pnand %p2859_p10, %p2853_p5 }
  0x49   : > { %2863 = shalt.err (!%p2860_p11)
}
  0x4a   : > { %s3678_s18 = smov 128   ;;  %s3679_s2 = smov 8  }
  0x4b   : > { %s3699_s10 = sld [smem:[#allocation33_spill]]  ;;  %s3092_s17 = smov [#allocation10]  }
  0x4c   : > { %s406_s21 = sshll.u32 %s3092_s17, 4  ;;  %s3093_s23 = smov [#allocation13]   ;;  %s407_s21 = int_to_ptr.vmem [resolvable:$true] %s406_s21 }
  0x4d   : > { %s435_s22 = sshll.u32 %s3093_s23, 4  ;;  %s2875_s28 = scalar_lea.vmem %s407_s21, 16  ;;  %s436_s22 = int_to_ptr.vmem [resolvable:$true] %s435_s22 }
  0x4e   : > { %p2876_p12 = scmp.ne.s32.totalorder %s407_s21, %s2875_s28  ;;  %s2882_s3 = scalar_lea.vmem %s407_s21, 32 }
  0x4f   : > { %p2883_p1 = scmp.lt.s32.totalorder %s407_s21, %s407_s21  ;;  %p2884_p3 = scmp.lt.s32.totalorder %s2882_s3, %s2875_s28 }
  0x50   : > { %p2878_p13 = pnand %p2876_p12, %p3226_p7 }
  0x51   : > { %2556 = dma.hbm_to_vmem [thread:$0]  (!%p3218_p6), %s3699_s10, 2048, %s452_s27, [#allocation15], %s3678_s18, %s3678_s18, %s3679_s2  }
  0x52   : > { %p2879_p0 = pneg %p2878_p13  ;;  %p2885_p4 = por %p2884_p3, %p2883_p1 }
  0x54   : > { %p2886_p2 = pnand %p2885_p4, %p2879_p0 }
  0x56   : > { %2889 = shalt.err (!%p2886_p2)
}
  0x57   : > { %s3700_s4 = sld [smem:[#allocation30_spill]]  ;;  %s2901_s14 = scalar_lea.vmem %s436_s22, 1024 }
  0x58   : > { %p2902_p5 = scmp.ne.s32.totalorder %s436_s22, %s2901_s14  ;;  %p2909_p10 = scmp.lt.s32.totalorder %s436_s22, %s436_s22 }
  0x59   : > { %p2910_p11 = scmp.lt.s32.totalorder %s2901_s14, %s2901_s14 }
  0x5a   : > { %p2904_p8 = pnand %p2902_p5, %p3226_p7 }
  0x5b   : > { %p2911_p12 = por %p2910_p11, %p2909_p10 }
  0x5c   : > { %p2905_p9 = pneg %p2904_p8 }
  0x5d   : > { %2547 = dma.hbm_to_vmem [thread:$0]  (!%p3218_p6), %s3700_s4, 16, %s407_s21, [#allocation9]  }
  0x5e   : > { %p2912_p13 = pnand %p2911_p12, %p2905_p9 }
  0x60   : > { %2915 = shalt.err (!%p2912_p13)
}
  0x61   : > { %s3094_s3 = smov 64   ;;  %s3095_s17 = smov 4  }
  0x62   : > { %s3701_s8 = sld [smem:[#allocation32_spill]]  ;;  %s3096_s21 = smov [#allocation16]  }
  0x63   : > { %s467_s27 = sshll.u32 %s3096_s21, 4  ;;  %s468_s27 = int_to_ptr.vmem [resolvable:$true] %s467_s27 }
  0x64   : > { %s2927_s24 = scalar_lea.vmem %s468_s27, 2048  ;;  %p2935_p4 = scmp.lt.s32.totalorder %s468_s27, %s468_s27 }
  0x65   : > { %p2928_p0 = scmp.ne.s32.totalorder %s468_s27, %s2927_s24  ;;  %p2936_p2 = scmp.lt.s32.totalorder %s2927_s24, %s2927_s24 }
  0x67   : > { %p2930_p1 = pnand %p2928_p0, %p3226_p7  ;;  %p2937_p5 = por %p2936_p2, %p2935_p4 }
  0x68   : > { %2553 = dma.hbm_to_vmem [thread:$0]  (!%p3218_p6), %s3701_s8, 1024, %s436_s22, [#allocation12], %s3094_s3, %s3094_s3, %s3095_s17  }
  0x69   : > { %p2931_p3 = pneg %p2930_p1 }
  0x6b   : > { %p2938_p8 = pnand %p2937_p5, %p2931_p3 }
  0x6d   : > { %2941 = shalt.err (!%p2938_p8)
}
  0x6e   : > { %s3702_s12 = sld [smem:[#allocation34_spill]]  ;;  %s2232_s26 = sadd.s32 4294967294, %s3082_s16  }
  0x6f   : > { %s3289_s25 = sadd.s32 1, %s3082_s16   ;;  %s43_s18 = sadd.s32 1, %s3078_s15 }
  0x70   : > { %s40_s22 = ssub.s32 %s3082_s16, %s3289_s25  ;;  %p50_p7 = scmp.ne.s32.totalorder %s3078_s15, %s3074_s30 }
  0x71   : > { %p41_p9 = scmp.eq.s32.totalorder %s40_s22, 0  ;;  %p51_p10 = scmp.eq.s32.totalorder %s3082_s16, 0 }
  0x72   : > { %p56_p11 = scmp.ne.s32.totalorder %s3074_s30, %s3070_s29  ;;  %p358_p12 = scmp.eq.s32.totalorder %s3204_s19, 1 }
  0x73   : > { %s3301_s23 = scalar_select %p41_p9, %s3078_s15, %s43_s18  }
  0x74   : > { %2559 = dma.hbm_to_vmem [thread:$0]  (!%p3218_p6), %s3702_s12, 2048, %s468_s27, [#allocation15], %s3094_s3, %s3094_s3, %s3095_s17  }
  0x75   : > { %3703 = sst [smem:[#allocation26_spill]] %s3301_s23  ;;  %p52_p13 = por %p51_p10, %p50_p7 }
  0x76   : > { %p3704_p0 = scmp.eq.s32.totalorder %s3204_s19, 0  ;;  %p3309_p6 = por %p358_p12, %p50_p7 }
  0x77   : > { %p364_p3 = scmp.eq.s32.totalorder %s2232_s26, 1  ;;  %p2578_p4 = scmp.lt.s32.totalorder %s3082_s16, 2 }
  0x78   : > { %p3305_p1 = por %p3704_p0, %p56_p11  ;;  %s3315_s28 = sand.u32 1, %s3078_s15  }
  0x79   : > { %s3706_s17 = scalar_select %p3309_p6, 1, 0 }
  0x7a   : > { %s3705_s3 = scalar_select %p3305_p1, 1, 0 }
  0x7b   : > { %p3317_p2 = por %p364_p3, %p56_p11  ;;  %s2242_s27 = sshll.u32 %s3315_s28, 4 }
  0x7c   : > { %s2343_s24 = sshll.u32 %s3082_s16, 8  ;;  %s3708_s0 = sld [smem:[#allocation27_spill]] }
  0x7d   : > { %s3707_s21 = scalar_select %p3317_p2, 1, 0 }
  0x7e   : > { %s488_s26 = scalar_lea.vmem [#allocation2], %s2242_s27  ;;  %p3328_p5 = pnand %p2578_p4, %p52_p13 }
  0x7f   : > { %s495_s2 = sshll.u32 %s488_s26, 4  ;;  %s3332_s2 = int_to_ptr.vmem [resolvable:$true] %s495_s2 }
  0x80   : > { %p2944_p7 = pneg %p3328_p5 }
  0x82   : > { %s3326_s22 = scalar_lea.hbm %s3708_s0, %s2343_s24  ;;  %s2947_s14 = scalar_lea.hbm %s3708_s0, 512 }
  0x83   : > { %s2942_s10 = scalar_lea.hbm %s3326_s22, 256  ;;  %p2948_p11 = scmp.lt.s32.totalorder %s3326_s22, %s3708_s0 }
  0x84   : > { %p2943_p8 = scmp.ne.s32.totalorder %s3326_s22, %s2942_s10  ;;  %p2949_p12 = scmp.lt.s32.totalorder %s2947_s14, %s2942_s10 }
  0x86   : > { %p2945_p9 = pnand %p2944_p7, %p2943_p8  ;;  %p2950_p13 = por %p2949_p12, %p2948_p11 }
  0x88   : > { %p2946_p10 = pneg %p2945_p9 }
  0x8a   : > { %p2951_p0 = pnand %p2950_p13, %p2946_p10 }
  0x8c   : > { %2954 = shalt.err (!%p2951_p0)
}
  0x8d   : > { %s2955_s6 = scalar_lea.vmem %s3332_s2, 256  ;;  %s3097_s27 = smov [#allocation2]  }
  0x8e   : > { %p2956_p3 = scmp.ne.s32.totalorder %s3332_s2, %s2955_s6  ;;  %s2960_s24 = sshll.u32 %s3097_s27, 4  ;;  %s2961_s24 = int_to_ptr.vmem [resolvable:$false] %s2960_s24 }
  0x8f   : > { %s2962_s8 = scalar_lea.vmem %s2961_s24, 512  ;;  %p2963_p9 = scmp.lt.s32.totalorder %s3332_s2, %s2961_s24 }
  0x90   : > { %p2958_p4 = pnand %p2956_p3, %p2944_p7  ;;  %p2964_p2 = scmp.lt.s32.totalorder %s2962_s8, %s2955_s6 }
  0x92   : > { %p2959_p8 = pneg %p2958_p4  ;;  %p2965_p6 = por %p2964_p2, %p2963_p9 }
  0x94   : > { %p2966_p11 = pnand %p2965_p6, %p2959_p8 }
  0x96   : > { %2969 = shalt.err (!%p2966_p11)
}
  0x97   : > { %s3710_s10 = smov 8   ;;  %s3711_s14 = smov 128  }
  0x98   : > { %s3712_s18 = scalar_lea.sflag [#allocation3], %s3315_s28  ;;  %s2245_s26 = sshll.u32 %s3082_s16, 4 }
  0x99   : > { %2563 = dma.hbm_to_vmem [thread:$0]  (!%p3328_p5), %s3326_s22, 256, %s3332_s2, %s3712_s18, %s3711_s14, %s3711_s14, %s3710_s10  }
  0x9a   : > { %s3369_s8 = scalar_lea.hbm %s3661_s1, %s2245_s26  ;;  %s508_s24 = scalar_lea.vmem [#allocation5], %s3315_s28 }
  0x9b   : > { %s515_s0 = sshll.u32 %s508_s24, 4  ;;  %s3713_s12 = sand.u32 1, %s3082_s16   ;;  %s516_s0 = int_to_ptr.vmem [resolvable:$true] %s515_s0 }
  0x9c   : > { %s506_s23 = scalar_lea.sflag [#allocation6], %s3713_s12  ;;  %s2970_s15 = scalar_lea.hbm %s3369_s8, 16 }
  0x9d   : > { %p2971_p6 = scmp.ne.s32.totalorder %s3369_s8, %s2970_s15  ;;  %s2975_s10 = scalar_lea.hbm %s3661_s1, 32 }
  0x9e   : > { %p2976_p12 = scmp.lt.s32.totalorder %s3369_s8, %s3661_s1  ;;  %p2977_p13 = scmp.lt.s32.totalorder %s2975_s10, %s2970_s15 }
  0x9f   : > { %p2973_p2 = pnand %p2971_p6, %p2944_p7 }
  0xa0   : > { %p2978_p0 = por %p2977_p13, %p2976_p12 }
  0xa1   : > { %p2974_p10 = pneg %p2973_p2 }
  0xa3   : > { %p2979_p3 = pnand %p2978_p0, %p2974_p10 }
  0xa5   : > { %2982 = shalt.err (!%p2979_p3)
}
  0xa6   : > { %s2983_s28 = scalar_lea.vmem %s516_s0, 16  ;;  %s3098_s12 = smov [#allocation5]  }
  0xa7   : > { %p2984_p4 = scmp.ne.s32.totalorder %s516_s0, %s2983_s28  ;;  %s2988_s26 = sshll.u32 %s3098_s12, 4  ;;  %s2989_s26 = int_to_ptr.vmem [resolvable:$false] %s2988_s26 }
  0xa8   : > { %s2990_s27 = scalar_lea.vmem %s2989_s26, 32  ;;  %p2991_p11 = scmp.lt.s32.totalorder %s516_s0, %s2989_s26 }
  0xa9   : > { %p2986_p8 = pnand %p2984_p4, %p2944_p7  ;;  %p2992_p6 = scmp.lt.s32.totalorder %s2990_s27, %s2983_s28 }
  0xab   : > { %p2987_p9 = pneg %p2986_p8  ;;  %p2993_p2 = por %p2992_p6, %p2991_p11 }
  0xad   : > { %p2994_p1 = pnand %p2993_p2, %p2987_p9 }
  0xaf   : > { %2997 = shalt.err (!%p2994_p1)
}
  0xb0   : > { %2566 = dma.hbm_to_vmem [thread:$0]  (!%p3328_p5), %s3369_s8, 16, %s516_s0, %s506_s23  }
  0xb1   : > { %p3714_p10 = scmp.ne.s32.totalorder %s3693_s20, 0 }
  0xb2   : > { %s3395_s15 = sand.u32 (!%p3714_p10), 1, %s3074_s30   ;;  %p3715_p1 = scmp.ne.s32.totalorder (!%p3714_p10), %s3705_s3, 0 }
  0xb3   : > { %524 = sbr.rel (%p3714_p10) target bundleno = 3750 (0xea6), region = 76  ;;  %s2247_s6 = sshll.u32 (!%p3714_p10), %s3395_s15, 4 }
  0xb4   : > { %s527_s24 = scalar_lea.sflag (!%p3714_p10), [#allocation3], %s3395_s15  ;;  %s3401_s2 = scalar_lea.vmem (!%p3714_p10), [#allocation2], %s2247_s6 }
  0xb8   : > { %3041 = dma.done.wait (%p3715_p1), %s527_s24, 256  }
  0xb9   : > { %3043 = vsyncadd (%p3715_p1), %s527_s24, 4294967040  ;;  %s535_s0 = sand.u32 1, %s3204_s19   ;;  %s538_s20 = scalar_lea.vmem [#allocation5], %s3395_s15 }
  0xba   : > { %s536_s4 = scalar_lea.sflag [#allocation6], %s535_s0 }
  0xbb   : > { %3045 = dma.done.wait (%p3715_p1), %s536_s4, 16  }
  0xbc   : > { %3047 = vsyncadd (%p3715_p1), %s536_s4, 4294967280  ;;  %p3716_p5 = scmp.eq.s32.totalorder %s3204_s19, 0 }
  0xbe   : > { %3049 = dma.done.wait (%p3716_p5), [#allocation6], 16   ;;  %p3717_p7 = pmov %p3716_p5 }
  0xbf   : > { %p3718_p12 = pmov %p3716_p5 }
  0xc0   : > { %3051 = vsyncadd (%p3717_p7), [#allocation6], 4294967280 }
  0xc1   : > { %3053 = dma.done.wait (%p3718_p12), [#allocation9], 32   ;;  %p3719_p13 = pmov %p3716_p5 }
  0xc2   : > { %p3720_p0 = pmov %p3716_p5 }
  0xc3   : > { %3055 = vsyncadd (%p3719_p13), [#allocation9], 4294967264 }
  0xc4   : > { %3057 = dma.done.wait (%p3720_p0), [#allocation12], 4096   ;;  %p3721_p3 = pmov %p3720_p0 }
  0xc5   : > { %p3722_p4 = pmov %p3720_p0 }
  0xc6   : > { %3059 = vsyncadd (%p3721_p3), [#allocation12], 4294963200 }
  0xc7   : > { %3061 = dma.done.wait (%p3722_p4), [#allocation15], 4096   ;;  %p3723_p8 = pmov %p3720_p0 }
  0xc8   : > { %v3099_v0 = vmov 0   ;;  %v2640_v1 = vld [vmem:[#allocation11 + $0xac] ss:$12 sps:$4 sm:$0xff]   ;;  %v2642_v2 = vld [vmem:[#allocation11 + $0xa8] ss:$12 sps:$4 sm:$0xff]   ;;  %v3100_v23 = vmov 0.0   ;;  %v666_v24 = vlaneseq }
  0xc9   : > { %3063 = vsyncadd (%p3723_p8), [#allocation15], 4294963200  ;;  %841 = vmatprep.mubr.bf16.mxu0 %v3099_v0  ;;  %809 = vmatprep.subr.bf16.mxu0 %v2640_v1  ;;  %v2643_v3 = vld [vmem:[#allocation11 + $0x94] ss:$12 sps:$4 sm:$0xff]   ;;  %v2645_v4 = vld [vmem:[#allocation11 + $0x90] ss:$12 sps:$4 sm:$0xff]  }
  0xca   : > { %810 = vmatpush1.bf16.msra.mxu0 %v2642_v2  ;;  %v2646_v5 = vld [vmem:[#allocation11 + $0x7c] ss:$12 sps:$4 sm:$0xff]   ;;  %v2648_v6 = vld [vmem:[#allocation11 + $0x78] ss:$12 sps:$4 sm:$0xff]   ;;  %v2651_v8 = vld [vmem:[#allocation11 + $0x60] ss:$12 sps:$4 sm:$0xff]   ;;  %2404 = vmatprep.subr.bf16.mxu1 %v3100_v23 }
  0xcb   : > { %811 = vmatprep.subr.bf16.mxu0 %v2643_v3  ;;  %v2649_v7 = vld [vmem:[#allocation11 + $0x64] ss:$12 sps:$4 sm:$0xff]   ;;  %v2652_v9 = vld [vmem:[#allocation11 + $0x4c] ss:$12 sps:$4 sm:$0xff]   ;;  %v2654_v10 = vld [vmem:[#allocation11 + $0x48] ss:$12 sps:$4 sm:$0xff]  }
  0xcc   : > { %v2655_v11 = vld [vmem:[#allocation11 + $0x34] ss:$12 sps:$4 sm:$0xff]   ;;  %v2657_v12 = vld [vmem:[#allocation11 + $0x30] ss:$12 sps:$4 sm:$0xff]   ;;  %v2660_v14 = vld [vmem:[#allocation11 + $0x18] ss:$12 sps:$4 sm:$0xff]  }
  0xcd   : > { %v2658_v13 = vld [vmem:[#allocation11 + $0x1c] ss:$12 sps:$4 sm:$0xff]   ;;  %v3434_v16 = vld [vmem:[%s3401_s2 + $0x8] sm:$0xff]  ;;  %vm3101_vm0 = vmmov 0   ;;  %v3444_v25 = vshrl.u32 %v666_v24, 7  ;;  %vm920_vm1 = vcmask 261120  }
  0xce   : > { %812 = vmatpush1.bf16.msra.mxu0 %v2645_v4  ;;  %v3431_v15 = vld [vmem:[%s3401_s2] sm:$0xff]  ;;  %v2661_v18 = vld [vmem:[#allocation11 + $0x4] ss:$12 sps:$4 sm:$0xff]   ;;  %2420 = vmatprep.mubr.msk.bf16.mxu1 %vm3101_vm0, %v3100_v23  ;;  %s3102_s8 = smov 96   ;;  %vm968_vm2 = vcmask 130048   ;;  %s3103_s22 = smov 64  }
  0xcf   : > { %813 = vmatprep.subr.bf16.mxu0 %v2646_v5  ;;  %v2256_v17 = vld [vmem:[#allocation8] ss:$0 sm:$0xff]  ;;  %v2663_v19 = vld [vmem:[#allocation11] ss:$12 sps:$4 sm:$0xff]   ;;  %v3447_v26 = vsub.s32 0, %v3444_v25  ;;  %v3450_v27 = vsub.s32 1, %v3444_v25 }
  0xd0   : > { %v629_v20 = vmul.f32 %v2256_v17, %v3431_v15  ;;  %v630_v21 = vmul.f32 %v2256_v17, %v3434_v16  ;;  %v3455_v28 = vld [vmem:[%s3667_s7] sm:$0x7]  ;;  %v2664_v44 = vld [vmem:[#allocation11 + $0xb0] ss:$12 sps:$4 sm:$0xff]   ;;  %v2666_v46 = vld [vmem:[#allocation11 + $0x80] ss:$12 sps:$4 sm:$0xff]  }
  0xd1   : > { %v669_v31 = vrot.slane %v3455_v28, %v3447_v26  ;;  %v673_v32 = vrot.slane %v3455_v28, %v3450_v27  ;;  %2405 = vmatpush3.bf16.msra.mxu1 %v2664_v44  ;;  %v2665_v45 = vld [vmem:[#allocation11 + $0x98] ss:$12 sps:$4 sm:$0xff]   ;;  %v2667_v47 = vld [vmem:[#allocation11 + $0x68] ss:$12 sps:$4 sm:$0xff]   ;;  %v2668_v48 = vld [vmem:[#allocation11 + $0x50] ss:$12 sps:$4 sm:$0xff]  }
  0xd2   : > { %814 = vmatpush1.bf16.msra.mxu0 %v2648_v6  ;;  %v631_v22 = vpack.c.bf16 %v630_v21, %v629_v20  ;;  %2406 = vmatprep.subr.bf16.mxu1 %v3100_v23  ;;  %v2669_v49 = vld [vmem:[#allocation11 + $0x38] ss:$12 sps:$4 sm:$0xff]   ;;  %v2670_v50 = vld [vmem:[#allocation11 + $0x20] ss:$12 sps:$4 sm:$0xff]   ;;  %v2671_v51 = vld [vmem:[#allocation11 + $0x8] ss:$12 sps:$4 sm:$0xff]  }
  0xd3   : > { %815 = vmatprep.subr.bf16.mxu0 %v2649_v7  ;;  %v3493_v55 = vld [vmem:[%s538_s20] ss:$0 sm:$0xff]  ;;  %v676_v17 = vsub.s32 2, %v3444_v25  ;;  %s3104_s10 = smov 32   ;;  %s2344_s0 = sshll.u32 %s3204_s19, 8 }
  0xd4   : > { %s614_s4 = scalar_lea.vmem [#allocation17], %s2247_s6  ;;  %p3725_p11 = scmp.ne.s32.totalorder %s3706_s17, 0 }
  0xd5   : > { %2407 = vmatpush3.bf16.msra.mxu1 %v2665_v45  ;;  %s2073_s20 = sshll.u32 %s614_s4, 4  ;;  %s3105_s19 = smov [#allocation17]   ;;  %s3617_s20 = int_to_ptr.vmem [resolvable:$true] %s2073_s20 }
  0xd6   : > { %816 = vmatpush1.bf16.msra.mxu0 %v2651_v8  ;;  %2408 = vmatprep.subr.bf16.mxu1 %v3100_v23  ;;  %s2998_s14 = scalar_lea.vmem %s3617_s20, 256  ;;  %s3002_s6 = sshll.u32 %s3105_s19, 4  ;;  %s3003_s6 = int_to_ptr.vmem [resolvable:$false] %s3002_s6 }
  0xd7   : > { %817 = vmatprep.subr.bf16.mxu0 %v2652_v9  ;;  %p2999_p9 = scmp.ne.s32.totalorder %s3617_s20, %s2998_s14  ;;  %s3004_s18 = scalar_lea.vmem %s3003_s6, 512 }
  0xd8   : > { %p3005_p10 = scmp.lt.s32.totalorder %s3617_s20, %s3003_s6  ;;  %p3006_p1 = scmp.lt.s32.totalorder %s3004_s18, %s2998_s14 }
  0xd9   : > { %2409 = vmatpush3.bf16.msra.mxu1 %v2666_v46  ;;  %p3000_p6 = pnand %p2999_p9, %p3725_p11 }
  0xda   : > { %818 = vmatpush1.bf16.msra.mxu0 %v2654_v10  ;;  %2410 = vmatprep.subr.bf16.mxu1 %v3100_v23  ;;  %p3007_p5 = por %p3006_p1, %p3005_p10 }
  0xdb   : > { %819 = vmatprep.subr.bf16.mxu0 %v2655_v11  ;;  %p3001_p2 = pneg %p3000_p6 }
  0xdd   : > { %2411 = vmatpush3.bf16.msra.mxu1 %v2667_v47  ;;  %p3008_p7 = pnand %p3007_p5, %p3001_p2 }
  0xde   : > { %820 = vmatpush1.bf16.msra.mxu0 %v2657_v12  ;;  %2412 = vmatprep.subr.bf16.mxu1 %v3100_v23 }
  0xdf   : > { %821 = vmatprep.subr.bf16.mxu0 %v2658_v13 }
  0xe1   : > { %2413 = vmatpush3.bf16.msra.mxu1 %v2668_v48 }
  0xe2   : > { %822 = vmatpush1.bf16.msra.mxu0 %v2660_v14  ;;  %2414 = vmatprep.subr.bf16.mxu1 %v3100_v23 }
  0xe3   : > { %823 = vmatprep.subr.bf16.mxu0 %v2661_v18 }
  0xe5   : > { %2415 = vmatpush3.bf16.msra.mxu1 %v2669_v49 }
  0xe6   : > { %824 = vmatpush1.bf16.msra.mxu0 %v2663_v19  ;;  %2416 = vmatprep.subr.bf16.mxu1 %v3100_v23  ;;  %v677_v19 = vrot.slane %v3455_v28, %v676_v17 }
  0xe7   : > { %2424 = vmatprep.subr.bf16.mxu0 %v3100_v23 }
  0xe9   : > { %842 = vmatmul.mubr.bf16.vlgmr.msra.gmra.mxu0 %v631_v22  ;;  %2417 = vmatpush3.bf16.msra.mxu1 %v2670_v50 }
  0xea   : > { %2426 = vmatprep.mubr.msk.bf16.mxu0 %vm3101_vm0, %v3100_v23  ;;  %2418 = vmatprep.subr.bf16.mxu1 %v3100_v23 }
  0xed   : > { %2419 = vmatpush3.bf16.msra.mxu1 %v2671_v51 }
  0xee   : > { %2430 = vmatprep.subr.bf16.mxu1 %v3100_v23 }
  0xf0   : > { %2421 = vmatmul.mubr.bf16.vlgmr.msra.gmra.mxu1 %v631_v22 }
  0xf1   : > { %2432 = vmatprep.mubr.msk.bf16.mxu1 %vm3101_vm0, %v3100_v23 }
 0x1a9   : > { %v843_v29 = vpop.f32.mrf.mxu0 }
 0x1aa   : > { %v844_v36 = vadd.f32 %v843_v29, %v669_v31 }
 0x1ab   : > { %v845_v30 = vpop.f32.mrf.mxu0 }
 0x1ac   : > { %v846_v37 = vadd.f32 %v845_v30, %v673_v32  ;;  %v909_v41 = vmul.f32 0.17677669, %v844_v36 }
 0x1ad   : > { %v847_v33 = vpop.f32.mrf.mxu0 }
 0x1ae   : > { %v848_v34 = vadd.f32 %v847_v33, %v669_v31 }
 0x1af   : > { %v849_v35 = vpop.f32.mrf.mxu0 }
 0x1b0   : > { %v850_v38 = vadd.f32 %v849_v35, %v673_v32  ;;  %v910_v39 = vmul.f32 0.17677669, %v848_v34  ;;  %v886_v18 = vpop.f32.mrf.mxu1 }
 0x1b1   : > { %v887_v21 = vadd.f32 %v886_v18, %v677_v19 }
 0x1b2   : > { %v3461_v40 = vpack.c.bf16 %v850_v38, %v846_v37  ;;  %v3467_v43 = vpack.c.bf16 %v910_v39, %v909_v41  ;;  %v2422_v20 = vpop.f32.mrf.mxu1 }
 0x1b4   : > { %1041 = vrot.lane.b32.xlu0 %v3461_v40, %s3102_s8  ;;  %v925_v42 = vsel %vm920_vm1, %v3461_v40, 0  ;;  %v889_v22 = vpop.f32.mrf.mxu1 }
 0x1b5   : > { %2425 = vmatpush3.bf16.xpose.msra.mxu0 %v925_v42  ;;  %v890_v24 = vadd.f32 %v889_v22, %v677_v19 }
 0x1b6   : > { %2436 = vmatprep.subr.bf16.mxu0 %v3100_v23  ;;  %v2423_v29 = vpop.f32.mrf.mxu1 }
 0x1b7   : > { %v3507_v31 = vpack.c.bf16 %v890_v24, %v887_v21 }
 0x1b8   : > { %1038 = vrot.lane.b32.xlu0 %v3467_v43, %s3102_s8 }
 0x1b9   : > { %2431 = vmatpush3.bf16.msra.mxu1 %v3507_v31 }
 0x1ba   : > { %2442 = vmatprep.subr.bf16.mxu1 %v3100_v23 }
 0x1bc   : > { %2427 = vmatmul.mubr.msk.bf16.vlgmr.msra.gmra.mxu0 %vm920_vm1, %v3467_v43 }
 0x1bd   : > { %2438 = vmatprep.mubr.msk.bf16.mxu0 %vm3101_vm0, %v3100_v23 }
 0x226   : > { %v1042_v52 = vpop.permute.xlu0 %1041 }
 0x227   : > { %v1047_v53 = vsel %vm920_vm1, %v1042_v52, 0  ;;  %v2674_v52 = vld [vmem:[#allocation13 + $0x18] sm:$0xff]  }
 0x228   : > { %2437 = vmatpush3.bf16.xpose.msra.mxu0 %v1047_v53 }
 0x229   : > { %2448 = vmatprep.subr.bf16.mxu0 %v3100_v23 }
 0x22a   : > { %v1039_v54 = vpop.permute.xlu0 %1038 }
 0x22f   : > { %2439 = vmatmul.mubr.msk.bf16.vlgmr.msra.gmra.mxu0 %vm920_vm1, %v1039_v54 }
 0x230   : > { %2452 = vmatprep.mubr.msk.bf16.mxu0 %vm3101_vm0, %v3100_v23  ;;  %2449 = vmatpush3.bf16.msra.mxu0 %v2674_v52 }
 0x231   : > { %2450 = vmatprep.subr.bf16.mxu0 %v3100_v23 }
 0x27c   : > { %v961_v56 = vpop.f32.mrf.mxu0 }
 0x27d   : > { %v962_v57 = vadd.f32 %v3493_v55, %v961_v56 }
 0x27e   : > { %v2428_v58 = vpop.f32.mrf.mxu0 }
 0x27f   : > { %v969_v59 = vsel %vm968_vm2, %v962_v57, -inf }
 0x280   : > { %970 = vmax.xlane.f32.xlu1 %v969_v59  ;;  %v964_v60 = vpop.f32.mrf.mxu0 }
 0x281   : > { %v965_v61 = vadd.f32 %v3493_v55, %v964_v60 }
 0x282   : > { %v2429_v62 = vpop.f32.mrf.mxu0 }
 0x283   : > { %v972_v63 = vsel %vm968_vm2, %v965_v61, -inf }
 0x284   : > { %973 = vmax.xlane.f32.xlu1 %v972_v63  ;;  %v2673_v63 = vld [vmem:[#allocation13] sm:$0xff]  }
 0x2ef   : > { %v1083_v1 = vpop.f32.mrf.mxu0 }
 0x2f0   : > { %v1084_v2 = vadd.f32 %v3493_v55, %v1083_v1  ;;  %v2675_v1 = vld [vmem:[#allocation13 + $0x10] sm:$0xff]  }
 0x2f1   : > { %v2440_v3 = vpop.f32.mrf.mxu0  ;;  %2451 = vmatpush3.bf16.msra.mxu0 %v2675_v1 }
 0x2f2   : > { %v1090_v4 = vsel %vm968_vm2, %v1084_v2, -inf  ;;  %2464 = vmatprep.subr.bf16.mxu0 %v3100_v23 }
 0x2f3   : > { %1091 = vmax.xlane.f32.xlu0 %v1090_v4  ;;  %v1086_v5 = vpop.f32.mrf.mxu0 }
 0x2f4   : > { %v1087_v6 = vadd.f32 %v3493_v55, %v1086_v5 }
 0x2f5   : > { %v2441_v7 = vpop.f32.mrf.mxu0 }
 0x2f6   : > { %v1093_v8 = vsel %vm968_vm2, %v1087_v6, -inf }
 0x2f7   : > { %1094 = vmax.xlane.f32.xlu1 %v1093_v8 }
 0x309   : > { %v971_v9 = vpop.xlane.xlu1 %970  ;;  %1276 = vrot.lane.b32.xlu0 %v3461_v40, %s3103_s22 }
 0x30a   : > { %v975_v10 = vsub.f32 %v962_v57, %v971_v9 }
 0x30c   : > { %v977_v11 = vmul.f32 1.442695, %v975_v10 }
 0x30d   : > { %v974_v12 = vpop.xlane.xlu1 %973 }
 0x30e   : > { %2720 = vpow2.f32 %v977_v11  ;;  %v976_v13 = vsub.f32 %v965_v61, %v974_v12  ;;  %v2672_v61 = vld [vmem:[#allocation13 + $0x8] sm:$0xff]  }
 0x310   : > { %v979_v14 = vmul.f32 1.442695, %v976_v13 }
 0x312   : > { %2722 = vpow2.f32 %v979_v14 }
 0x31b   : > { %v2721_v30 = vpop.eup %2720 }
 0x31c   : > { %v981_v32 = vsel %vm968_vm2, %v2721_v30, 0.0 }
 0x31d   : > { %982 = vadd.xlane.f32.xlu1 %v981_v32 }
 0x31f   : > { %v2723_v33 = vpop.eup %2722 }
 0x320   : > { %v984_v25 = vsel %vm968_vm2, %v2723_v33, 0.0 }
 0x321   : > { %985 = vadd.xlane.f32.xlu1 %v984_v25 }
 0x37c   : > { %v1092_v28 = vpop.xlane.xlu0 %1091 }
 0x37d   : > { %v1096_v34 = vsub.f32 %v1084_v2, %v1092_v28 }
 0x37f   : > { %v1098_v35 = vmul.f32 1.442695, %v1096_v34 }
 0x380   : > { %v1095_v36 = vpop.xlane.xlu1 %1094  ;;  %v1277_v9 = vpop.permute.xlu0 %1276 }
 0x381   : > { %2724 = vpow2.f32 %v1098_v35  ;;  %v1097_v37 = vsub.f32 %v1087_v6, %v1095_v36  ;;  %v1282_v13 = vsel %vm920_vm1, %v1277_v9, 0 }
 0x383   : > { %v1100_v38 = vmul.f32 1.442695, %v1097_v37 }
 0x385   : > { %2726 = vpow2.f32 %v1100_v38 }
 0x38e   : > { %v2725_v39 = vpop.eup %2724 }
 0x38f   : > { %v1102_v41 = vsel %vm968_vm2, %v2725_v39, 0.0 }
 0x390   : > { %1103 = vadd.xlane.f32.xlu1 %v1102_v41 }
 0x392   : > { %v2727_v42 = vpop.eup %2726 }
 0x393   : > { %v1105_v44 = vsel %vm968_vm2, %v2727_v42, 0.0 }
 0x394   : > { %1106 = vadd.xlane.f32.xlu1 %v1105_v44 }
 0x3a5   : > { %1114 = vrot.lane.b32.xlu1 %v3507_v31, %s3102_s8  ;;  %s3724_s8 = sld [smem:[#allocation35_spill]] }
 0x3a6   : > { %v983_v45 = vpop.xlane.xlu1 %982 }
 0x3a7   : > { %2728 = vrcp.f32 %v983_v45 }
 0x3a9   : > { %1274 = vrot.lane.b32.xlu1 %v3467_v43, %s3103_s22 }
 0x3aa   : > { %v986_v46 = vpop.xlane.xlu1 %985 }
 0x3ab   : > { %2730 = vrcp.f32 %v986_v46 }
 0x3b4   : > { %v2729_v47 = vpop.eup %2728 }
 0x3b5   : > { %v988_v49 = vmul.f32 %v2729_v47, %v2721_v30 }
 0x3b8   : > { %v2731_v48 = vpop.eup %2730 }
 0x3b9   : > { %v990_v50 = vmul.f32 %v2731_v48, %v2723_v33 }
 0x3bb   : > { %v991_v51 = vpack.c.bf16 %v990_v50, %v988_v49 }
 0x3bd   : > { %2433 = vmatmul.mubr.msk.bf16.vlgmr.msra.gmra.mxu1 %vm968_vm2, %v991_v51 }
 0x3be   : > { %2444 = vmatprep.mubr.msk.bf16.mxu1 %vm3101_vm0, %v3100_v23 }
 0x419   : > { %v1104_v53 = vpop.xlane.xlu1 %1103 }
 0x41a   : > { %2732 = vrcp.f32 %v1104_v53 }
 0x41d   : > { %v1107_v54 = vpop.xlane.xlu1 %1106 }
 0x41e   : > { %2734 = vrcp.f32 %v1107_v54 }
 0x421   : > { %v1115_v56 = vpop.permute.xlu1 %1114 }
 0x422   : > { %2443 = vmatpush3.bf16.msra.mxu1 %v1115_v56 }
 0x423   : > { %2456 = vmatprep.subr.bf16.mxu1 %v3100_v23 }
 0x425   : > { %v1275_v14 = vpop.permute.xlu1 %1274 }
 0x427   : > { %v2733_v57 = vpop.eup %2732 }
 0x428   : > { %v1109_v59 = vmul.f32 %v2733_v57, %v2725_v39 }
 0x42b   : > { %v2735_v58 = vpop.eup %2734 }
 0x42c   : > { %v1111_v60 = vmul.f32 %v2735_v58, %v2727_v42 }
 0x42e   : > { %v1112_v62 = vpack.c.bf16 %v1111_v60, %v1109_v59  ;;  %v2677_v60 = vld [vmem:[#allocation13 + $0x20] sm:$0xff]  }
 0x430   : > { %2445 = vmatmul.mubr.msk.bf16.vlgmr.msra.gmra.mxu1 %vm968_vm2, %v1112_v62 }
 0x431   : > { %2457 = vmatpush3.bf16.msra.mxu1 %v2672_v61  ;;  %2460 = vmatprep.mubr.msk.bf16.mxu1 %vm3101_vm0, %v3100_v23 }
 0x432   : > { %2458 = vmatprep.subr.bf16.mxu1 %v3100_v23 }
 0x435   : > { %2459 = vmatpush3.bf16.msra.mxu1 %v2673_v63 }
 0x436   : > { %2470 = vmatprep.subr.bf16.mxu1 %v3100_v23 }
 0x47d   : > { %v1029_v2 = vpop.f32.mrf.mxu1 }
 0x47f   : > { %v2434_v3 = vpop.f32.mrf.mxu1 }
 0x481   : > { %v1032_v4 = vpop.f32.mrf.mxu1 }
 0x482   : > { %v1036_v5 = vpack.c.bf16 %v1032_v4, %v1029_v2 }
 0x483   : > { %v2435_v6 = vpop.f32.mrf.mxu1 }
 0x484   : > { %2461 = vmatmul.mubr.msk.bf16.vlgmr.msra.gmra.mxu1 %vm920_vm1, %v1036_v5 }
 0x485   : > { %2472 = vmatprep.mubr.msk.bf16.mxu1 %vm3101_vm0, %v3100_v23 }
 0x4f0   : > { %v1154_v7 = vpop.f32.mrf.mxu1 }
 0x4f2   : > { %v2446_v8 = vpop.f32.mrf.mxu1 }
 0x4f4   : > { %v1157_v10 = vpop.f32.mrf.mxu1 }
 0x4f5   : > { %v1161_v11 = vpack.c.bf16 %v1157_v10, %v1154_v7 }
 0x4f6   : > { %v2447_v12 = vpop.f32.mrf.mxu1 }
 0x4f7   : > { %2453 = vmatmul.mubr.msk.bf16.vlgmr.msra.gmra.mxu0 %vm920_vm1, %v1161_v11 }
 0x4f8   : > { %2465 = vmatpush3.bf16.xpose.msra.mxu0 %v1282_v13  ;;  %2466 = vmatprep.mubr.msk.bf16.mxu0 %vm3101_vm0, %v3100_v23 }
 0x4f9   : > { %2476 = vmatprep.subr.bf16.mxu0 %v3100_v23 }
 0x4ff   : > { %2467 = vmatmul.mubr.msk.bf16.vlgmr.msra.gmra.mxu0 %vm920_vm1, %v1275_v14 }
 0x500   : > { %2480 = vmatprep.mubr.msk.bf16.mxu0 %vm3101_vm0, %v3100_v23 }
 0x544   : > { %v3541_v17 = vpop.f32.mrf.mxu1 }
 0x546   : > { %v2462_v18 = vpop.f32.mrf.mxu1 }
 0x548   : > { %v3543_v19 = vpop.f32.mrf.mxu1 }
 0x54a   : > { %v2463_v20 = vpop.f32.mrf.mxu1 }
 0x5b7   : > { %v3545_v21 = vpop.f32.mrf.mxu0 }
 0x5b9   : > { %v2454_v22 = vpop.f32.mrf.mxu0 }
 0x5bb   : > { %v3547_v24 = vpop.f32.mrf.mxu0 }
 0x5bd   : > { %v2455_v29 = vpop.f32.mrf.mxu0 }
 0x5bf   : > { %v1318_v30 = vpop.f32.mrf.mxu0 }
 0x5c0   : > { %v1319_v32 = vadd.f32 %v3493_v55, %v1318_v30 }
 0x5c1   : > { %v2468_v33 = vpop.f32.mrf.mxu0 }
 0x5c2   : > { %v1325_v25 = vsel %vm968_vm2, %v1319_v32, -inf }
 0x5c3   : > { %1326 = vmax.xlane.f32.xlu1 %v1325_v25  ;;  %v1321_v28 = vpop.f32.mrf.mxu0 }
 0x5c4   : > { %v1322_v34 = vadd.f32 %v3493_v55, %v1321_v28 }
 0x5c5   : > { %v2469_v35 = vpop.f32.mrf.mxu0 }
 0x5c6   : > { %v1328_v36 = vsel %vm968_vm2, %v1322_v34, -inf }
 0x5c7   : > { %1329 = vmax.xlane.f32.xlu0 %v1328_v36 }
 0x5dd   : > { %1348 = vrot.lane.b32.xlu0 %v3507_v31, %s3103_s22  ;;  %s3615_s22 = scalar_lea.hbm %s3724_s8, %s2344_s0 }
 0x64c   : > { %v1327_v37 = vpop.xlane.xlu1 %1326 }
 0x64d   : > { %v1331_v38 = vsub.f32 %v1319_v32, %v1327_v37 }
 0x64f   : > { %v1333_v39 = vmul.f32 1.442695, %v1331_v38 }
 0x650   : > { %v1330_v41 = vpop.xlane.xlu0 %1329 }
 0x651   : > { %2736 = vpow2.f32 %v1333_v39  ;;  %v1332_v42 = vsub.f32 %v1322_v34, %v1330_v41  ;;  %v1271_v34 = vadd.f32 %v3543_v19, %v3547_v24  ;;  %v2679_v19 = vld [vmem:[#allocation13 + $0x30] sm:$0xff]  }
 0x653   : > { %v1335_v44 = vmul.f32 1.442695, %v1332_v42 }
 0x654   : > { %v1349_v45 = vpop.permute.xlu0 %1348 }
 0x655   : > { %2738 = vpow2.f32 %v1335_v44  ;;  %2471 = vmatpush3.bf16.msra.mxu1 %v1349_v45 }
 0x656   : > { %2484 = vmatprep.subr.bf16.mxu1 %v3100_v23 }
 0x65e   : > { %v2737_v46 = vpop.eup %2736 }
 0x65f   : > { %v1337_v47 = vsel %vm968_vm2, %v2737_v46, 0.0 }
 0x660   : > { %1338 = vadd.xlane.f32.xlu1 %v1337_v47 }
 0x662   : > { %v2739_v48 = vpop.eup %2738 }
 0x663   : > { %v1340_v49 = vsel %vm968_vm2, %v2739_v48, 0.0 }
 0x664   : > { %1341 = vadd.xlane.f32.xlu1 %v1340_v49 }
 0x675   : > { %1456 = vrot.lane.b32.xlu1 %v3461_v40, %s3104_s10 }
 0x679   : > { %1454 = vrot.lane.b32.xlu1 %v3467_v43, %s3104_s10  ;;  %v2676_v43 = vld [vmem:[#allocation13 + $0x28] sm:$0xff]  }
 0x67a   : > { %2477 = vmatpush3.bf16.msra.mxu0 %v2676_v43 }
 0x67b   : > { %2478 = vmatprep.subr.bf16.mxu0 %v3100_v23 }
 0x67e   : > { %2479 = vmatpush3.bf16.msra.mxu0 %v2677_v60 }
 0x67f   : > { %2490 = vmatprep.subr.bf16.mxu0 %v3100_v23 }
 0x6e9   : > { %v1339_v50 = vpop.xlane.xlu1 %1338 }
 0x6ea   : > { %2740 = vrcp.f32 %v1339_v50  ;;  %v2303_v50 = vld [vmem:[#allocation7] ss:$0 sm:$0xff] }
 0x6ed   : > { %v1342_v51 = vpop.xlane.xlu1 %1341 }
 0x6ee   : > { %2742 = vrcp.f32 %v1342_v51 }
 0x6f1   : > { %v1457_v57 = vpop.permute.xlu1 %1456 }
 0x6f2   : > { %v1462_v59 = vsel %vm920_vm1, %v1457_v57, 0 }
 0x6f5   : > { %v1455_v40 = vpop.permute.xlu1 %1454 }
 0x6f7   : > { %v2741_v52 = vpop.eup %2740 }
 0x6f8   : > { %v1344_v54 = vmul.f32 %v2741_v52, %v2737_v46  ;;  %v2302_v52 = vld [vmem:[%s3669_s9] ss:$0 sm:$0xff] }
 0x6fb   : > { %v2743_v53 = vpop.eup %2742 }
 0x6fc   : > { %v1346_v56 = vmul.f32 %v2743_v53, %v2739_v48  ;;  %v1649_v53 = vmul.f32 %v2303_v50, %v3431_v15 }
 0x6fe   : > { %v1347_v58 = vpack.c.bf16 %v1346_v56, %v1344_v54 }
 0x700   : > { %2473 = vmatmul.mubr.msk.bf16.vlgmr.msra.gmra.mxu1 %vm968_vm2, %v1347_v58 }
 0x701   : > { %2485 = vmatpush3.bf16.xpose.msra.mxu1 %v1462_v59  ;;  %2486 = vmatprep.mubr.msk.bf16.mxu1 %vm3101_vm0, %v3100_v23  ;;  %v1650_v59 = vmul.f32 %v2303_v50, %v3434_v16  ;;  %v2685_v16 = vld [vmem:[#allocation14 + $0x64] ss:$8 sps:$4 sm:$0xff]   ;;  %v2714_v50 = vld [vmem:[#allocation16 + $0x50] sm:$0xff]  }
 0x702   : > { %2496 = vmatprep.subr.bf16.mxu1 %v3100_v23 }
 0x708   : > { %2487 = vmatmul.mubr.msk.bf16.vlgmr.msra.gmra.mxu1 %vm920_vm1, %v1455_v40 }
 0x709   : > { %2500 = vmatprep.mubr.msk.bf16.mxu1 %vm3101_vm0, %v3100_v23 }
 0x7c0   : > { %v1388_v61 = vpop.f32.mrf.mxu1 }
 0x7c2   : > { %v2474_v62 = vpop.f32.mrf.mxu1 }
 0x7c3   : > { %v2682_v62 = vld [vmem:[#allocation14 + $0x74] ss:$8 sps:$4 sm:$0xff]  }
 0x7c4   : > { %v1391_v63 = vpop.f32.mrf.mxu1 }
 0x7c5   : > { %v1395_v1 = vpack.c.bf16 %v1391_v63, %v1388_v61  ;;  %v2680_v61 = vld [vmem:[#allocation14 + $0x70] ss:$8 sps:$4 sm:$0xff]  }
 0x7c6   : > { %v2475_v2 = vpop.f32.mrf.mxu1 }
 0x7c7   : > { %2481 = vmatmul.mubr.msk.bf16.vlgmr.msra.gmra.mxu0 %vm920_vm1, %v1395_v1 }
 0x7c8   : > { %v1498_v3 = vpop.f32.mrf.mxu1  ;;  %2492 = vmatprep.mubr.msk.bf16.mxu0 %vm3101_vm0, %v3100_v23 }
 0x7c9   : > { %v1499_v4 = vadd.f32 %v3493_v55, %v1498_v3 }
 0x7ca   : > { %v2488_v5 = vpop.f32.mrf.mxu1 }
 0x7cb   : > { %v1505_v6 = vsel %vm968_vm2, %v1499_v4, -inf }
 0x7cc   : > { %1506 = vmax.xlane.f32.xlu0 %v1505_v6  ;;  %v1501_v7 = vpop.f32.mrf.mxu1 }
 0x7cd   : > { %v1502_v8 = vadd.f32 %v3493_v55, %v1501_v7  ;;  %v2683_v7 = vld [vmem:[#allocation14 + $0x60] ss:$8 sps:$4 sm:$0xff]  }
 0x7ce   : > { %v2489_v9 = vpop.f32.mrf.mxu1 }
 0x7cf   : > { %v1508_v10 = vsel %vm968_vm2, %v1502_v8, -inf  ;;  %v2686_v9 = vld [vmem:[#allocation14 + $0x50] ss:$8 sps:$4 sm:$0xff]  }
 0x7d0   : > { %1509 = vmax.xlane.f32.xlu1 %v1508_v10  ;;  %v2691_v10 = vld [vmem:[#allocation14 + $0x44] ss:$8 sps:$4 sm:$0xff]  }
 0x7e1   : > { %1528 = vrot.lane.b32.xlu1 %v3507_v31, %s3104_s10  ;;  %v1268_v31 = vadd.f32 %v3541_v17, %v3545_v21  ;;  %v2678_v17 = vld [vmem:[#allocation13 + $0x38] sm:$0xff]   ;;  %s2060_s10 = scalar_lea.sflag [#allocation4], %s3395_s15 }
 0x7e2   : > { %2497 = vmatpush3.bf16.msra.mxu1 %v2678_v17  ;;  %v2304_v17 = vld [vmem:[#allocation10] ss:$0 sm:$0xff] }
 0x7e3   : > { %2498 = vmatprep.subr.bf16.mxu1 %v3100_v23 }
 0x7e6   : > { %2499 = vmatpush3.bf16.msra.mxu1 %v2679_v19 }
 0x855   : > { %v1507_v11 = vpop.xlane.xlu0 %1506 }
 0x856   : > { %v1511_v12 = vsub.f32 %v1499_v4, %v1507_v11  ;;  %v2689_v11 = vld [vmem:[#allocation14 + $0x40] ss:$8 sps:$4 sm:$0xff]  }
 0x858   : > { %v1513_v13 = vmul.f32 1.442695, %v1511_v12  ;;  %v2694_v12 = vld [vmem:[#allocation14 + $0x34] ss:$8 sps:$4 sm:$0xff]  }
 0x859   : > { %v1510_v14 = vpop.xlane.xlu1 %1509 }
 0x85a   : > { %2744 = vpow2.f32 %v1513_v13  ;;  %v1512_v18 = vsub.f32 %v1502_v8, %v1510_v14  ;;  %v2688_v8 = vld [vmem:[#allocation14 + $0x54] ss:$8 sps:$4 sm:$0xff]   ;;  %v2692_v13 = vld [vmem:[#allocation14 + $0x30] ss:$8 sps:$4 sm:$0xff]   ;;  %v2697_v14 = vld [vmem:[#allocation14 + $0x24] ss:$8 sps:$4 sm:$0xff]  }
 0x85c   : > { %v1515_v20 = vmul.f32 1.442695, %v1512_v18  ;;  %v2695_v18 = vld [vmem:[#allocation14 + $0x20] ss:$8 sps:$4 sm:$0xff]  }
 0x85d   : > { %v1529_v22 = vpop.permute.xlu1 %1528 }
 0x85e   : > { %2746 = vpow2.f32 %v1515_v20  ;;  %2491 = vmatpush3.bf16.msra.mxu0 %v1529_v22  ;;  %v2700_v20 = vld [vmem:[#allocation14 + $0x14] ss:$8 sps:$4 sm:$0xff]   ;;  %v2698_v22 = vld [vmem:[#allocation14 + $0x10] ss:$8 sps:$4 sm:$0xff]  }
 0x85f   : > { %1793 = vmatprep.subr.bf16.mxu0 %v2682_v62 }
 0x867   : > { %v2745_v29 = vpop.eup %2744 }
 0x868   : > { %v1517_v55 = vsel %vm968_vm2, %v2745_v29, 0.0 }
 0x869   : > { %1518 = vadd.xlane.f32.xlu0 %v1517_v55  ;;  %v2701_v55 = vld [vmem:[#allocation14] ss:$8 sps:$4 sm:$0xff]  }
 0x86b   : > { %v2747_v30 = vpop.eup %2746 }
 0x86c   : > { %v1520_v32 = vsel %vm968_vm2, %v2747_v30, 0.0 }
 0x86d   : > { %1521 = vadd.xlane.f32.xlu0 %v1520_v32  ;;  %v2705_v32 = vld [vmem:[#allocation16 + $0x38] sm:$0xff]  }
 0x887   : > { %v1445_v33 = vpop.f32.mrf.mxu0 }
 0x888   : > { %v1452_v25 = vadd.f32 %v1445_v33, %v1268_v31  ;;  %v2706_v31 = vld [vmem:[#allocation16 + $0x70] sm:$0xff]  }
 0x889   : > { %v2482_v28 = vpop.f32.mrf.mxu0  ;;  %v2707_v33 = vld [vmem:[#allocation16 + $0x30] sm:$0xff]  }
 0x88a   : > { %v2709_v28 = vld [vmem:[#allocation16 + $0x28] sm:$0xff]  }
 0x88b   : > { %v1448_v35 = vpop.f32.mrf.mxu0 }
 0x88c   : > { %v1453_v36 = vadd.f32 %v1448_v35, %v1271_v34  ;;  %v2710_v34 = vld [vmem:[#allocation16 + $0x60] sm:$0xff]  }
 0x88d   : > { %v2483_v37 = vpop.f32.mrf.mxu0  ;;  %v2711_v35 = vld [vmem:[#allocation16 + $0x20] sm:$0xff]  }
 0x8f2   : > { %v1519_v38 = vpop.xlane.xlu0 %1518 }
 0x8f3   : > { %2748 = vrcp.f32 %v1519_v38 }
 0x8f6   : > { %v1522_v39 = vpop.xlane.xlu0 %1521 }
 0x8f7   : > { %2750 = vrcp.f32 %v1522_v39 }
 0x900   : > { %v2749_v41 = vpop.eup %2748 }
 0x901   : > { %v1524_v44 = vmul.f32 %v2749_v41, %v2745_v29  ;;  %v2703_v29 = vld [vmem:[#allocation14 + $0x4] ss:$8 sps:$4 sm:$0xff]  }
 0x904   : > { %v2751_v42 = vpop.eup %2750 }
 0x905   : > { %v1526_v45 = vmul.f32 %v2751_v42, %v2747_v30  ;;  %v2704_v30 = vld [vmem:[#allocation16 + $0x78] sm:$0xff]  }
 0x906   : > { %2382 = vmatprep.subr.bf16.mxu1 %v2704_v30 }
 0x907   : > { %v1527_v46 = vpack.c.bf16 %v1526_v45, %v1524_v44 }
 0x909   : > { %2493 = vmatmul.mubr.msk.bf16.vlgmr.msra.gmra.mxu0 %vm968_vm2, %v1527_v46 }
 0x90a   : > { %1825 = vmatprep.mubr.bf16.mxu0 %v3099_v0  ;;  %1794 = vmatpush1.bf16.msra.mxu0 %v2680_v61  ;;  %v621_v61 = vld [vmem:[%s3665_s5] sm:$0x3] }
 0x90b   : > { %1795 = vmatprep.subr.bf16.mxu0 %v2685_v16 }
 0x90e   : > { %1796 = vmatpush1.bf16.msra.mxu0 %v2683_v7 }
 0x90f   : > { %1797 = vmatprep.subr.bf16.mxu0 %v2688_v8 }
 0x912   : > { %1798 = vmatpush1.bf16.msra.mxu0 %v2686_v9 }
 0x913   : > { %1799 = vmatprep.subr.bf16.mxu0 %v2691_v10 }
 0x916   : > { %1800 = vmatpush1.bf16.msra.mxu0 %v2689_v11 }
 0x917   : > { %1801 = vmatprep.subr.bf16.mxu0 %v2694_v12 }
 0x91a   : > { %1802 = vmatpush1.bf16.msra.mxu0 %v2692_v13  ;;  %v2321_v13 = vld [vmem:[%s3673_s13] ss:$0 sm:$0xff] }
 0x91b   : > { %1803 = vmatprep.subr.bf16.mxu0 %v2697_v14 }
 0x91e   : > { %1804 = vmatpush1.bf16.msra.mxu0 %v2695_v18 }
 0x91f   : > { %1805 = vmatprep.subr.bf16.mxu0 %v2700_v20 }
 0x922   : > { %1806 = vmatpush1.bf16.msra.mxu0 %v2698_v22 }
 0x923   : > { %1807 = vmatprep.subr.bf16.mxu0 %v2703_v29 }
 0x926   : > { %1808 = vmatpush1.bf16.msra.mxu0 %v2701_v55 }
 0x9c9   : > { %v1568_v21 = vpop.f32.mrf.mxu0 }
 0x9cb   : > { %v2494_v24 = vpop.f32.mrf.mxu0 }
 0x9cd   : > { %v1571_v47 = vpop.f32.mrf.mxu0 }
 0x9ce   : > { %v1575_v48 = vpack.c.bf16 %v1571_v47, %v1568_v21 }
 0x9cf   : > { %v2495_v49 = vpop.f32.mrf.mxu0 }
 0x9d0   : > { %2501 = vmatmul.mubr.msk.bf16.vlgmr.msra.gmra.mxu1 %vm920_vm1, %v1575_v48  ;;  %v2712_v48 = vld [vmem:[#allocation16 + $0x58] sm:$0xff]  }
 0x9d1   : > { %2383 = vmatpush3.bf16.msra.mxu1 %v2705_v32  ;;  %v2713_v49 = vld [vmem:[#allocation16 + $0x18] sm:$0xff]  }
 0x9d2   : > { %2384 = vmatprep.subr.bf16.mxu1 %v2706_v31 }
 0x9d5   : > { %2385 = vmatpush3.bf16.msra.mxu1 %v2707_v33 }
 0xa90   : > { %v1625_v51 = vpop.f32.mrf.mxu1 }
 0xa91   : > { %v1632_v0 = vadd.f32 %v1625_v51, %v1452_v25  ;;  %v2708_v25 = vld [vmem:[#allocation16 + $0x68] sm:$0xff]   ;;  %v2715_v51 = vld [vmem:[#allocation16 + $0x10] sm:$0xff]  }
 0xa92   : > { %v2502_v54 = vpop.f32.mrf.mxu1  ;;  %2386 = vmatprep.subr.bf16.mxu1 %v2708_v25 }
 0xa93   : > { %v1641_v23 = vadd.f32 %v2302_v52, %v1632_v0  ;;  %2387 = vmatpush3.bf16.msra.mxu1 %v2709_v28  ;;  %v2717_v0 = vld [vmem:[#allocation16 + $0x8] sm:$0xff]   ;;  %v2719_v54 = vld [vmem:[#allocation16] sm:$0xff]  }
 0xa94   : > { %v1628_v56 = vpop.f32.mrf.mxu1  ;;  %2388 = vmatprep.subr.bf16.mxu1 %v2710_v34 }
 0xa95   : > { %v1633_v57 = vadd.f32 %v1628_v56, %v1453_v36  ;;  %v1651_v58 = vadd.f32 %v1649_v53, %v1641_v23  ;;  %v2718_v53 = vld [vmem:[#allocation16 + $0x40] sm:$0xff]   ;;  %v1701_v23 = vld [vmem:[%s3671_s11] sm:$0x3] }
 0xa96   : > { %v2503_v40 = vpop.f32.mrf.mxu1  ;;  %v1710_v56 = vrot.slane %v1701_v23, %v3450_v27 }
 0xa97   : > { %v1642_v43 = vadd.f32 %v2302_v52, %v1633_v57  ;;  %1653 = vadd.xlane.f32.xlu0 %v1651_v58  ;;  %2389 = vmatpush3.bf16.msra.mxu1 %v2711_v35  ;;  %v2716_v52 = vld [vmem:[#allocation16 + $0x48] sm:$0xff]   ;;  %v1706_v57 = vrot.slane %v1701_v23, %v3447_v26 }
 0xa98   : > { %2390 = vmatprep.subr.bf16.mxu1 %v2712_v48 }
 0xa99   : > { %v1652_v60 = vadd.f32 %v1650_v59, %v1642_v43 }
 0xa9b   : > { %1655 = vadd.xlane.f32.xlu0 %v1652_v60  ;;  %2391 = vmatpush3.bf16.msra.mxu1 %v2713_v49 }
 0xa9c   : > { %2392 = vmatprep.subr.bf16.mxu1 %v2714_v50 }
 0xa9f   : > { %2393 = vmatpush3.bf16.msra.mxu1 %v2715_v51 }
 0xaa0   : > { %2394 = vmatprep.subr.bf16.mxu1 %v2716_v52 }
 0xaa3   : > { %2395 = vmatpush3.bf16.msra.mxu1 %v2717_v0 }
 0xaa4   : > { %2396 = vmatprep.subr.bf16.mxu1 %v2718_v53 }
 0xaa7   : > { %2397 = vmatpush3.bf16.msra.mxu1 %v2719_v54 }
 0xb20   : > { %v1654_v63 = vpop.xlane.xlu0 %1653 }
 0xb21   : > { %v1658_v1 = vmul.f32 0.0078125, %v1654_v63 }
 0xb23   : > { %v1660_v2 = vsub.f32 %v1651_v58, %v1658_v1 }
 0xb24   : > { %v1656_v15 = vpop.xlane.xlu0 %1655 }
 0xb25   : > { %v1659_v3 = vmul.f32 0.0078125, %v1656_v15  ;;  %v1662_v4 = vmul.f32 %v1660_v2, %v1660_v2 }
 0xb27   : > { %v1661_v5 = vsub.f32 %v1652_v60, %v1659_v3  ;;  %1664 = vadd.xlane.f32.xlu0 %v1662_v4 }
 0xb29   : > { %v1663_v6 = vmul.f32 %v1661_v5, %v1661_v5 }
 0xb2b   : > { %1666 = vadd.xlane.f32.xlu0 %v1663_v6 }
 0xbb0   : > { %v1665_v36 = vpop.xlane.xlu0 %1664 }
 0xbb1   : > { %v1668_v37 = vmul.f32 0.0078125, %v1665_v36 }
 0xbb3   : > { %v1670_v38 = vadd.f32 1e-05, %v1668_v37 }
 0xbb4   : > { %v1667_v39 = vpop.xlane.xlu0 %1666 }
 0xbb5   : > { %2752 = vrsqrt.f32 %v1670_v38  ;;  %v1669_v41 = vmul.f32 0.0078125, %v1667_v39 }
 0xbb7   : > { %v1671_v42 = vadd.f32 1e-05, %v1669_v41 }
 0xbb9   : > { %2754 = vrsqrt.f32 %v1671_v42 }
 0xbc2   : > { %v2753_v44 = vpop.eup %2752 }
 0xbc3   : > { %v1674_v45 = vmul.f32 %v2753_v44, %v1660_v2  ;;  %v1848_v2 = vrot.slane %v621_v61, %v3450_v27 }
 0xbc5   : > { %v1682_v21 = vmul.f32 %v2304_v17, %v1674_v45 }
 0xbc6   : > { %v2755_v46 = vpop.eup %2754 }
 0xbc7   : > { %v1675_v19 = vmul.f32 %v2755_v46, %v1661_v5  ;;  %v1844_v5 = vrot.slane %v621_v61, %v3447_v26 }
 0xbc9   : > { %v1683_v24 = vmul.f32 %v2304_v17, %v1675_v19 }
 0xbcb   : > { %v1684_v47 = vpack.c.bf16 %v1683_v24, %v1682_v21 }
 0xbcd   : > { %1826 = vmatmul.mubr.bf16.vlgmr.msra.gmra.mxu0 %v1684_v47 }
 0xc8d   : > { %v1827_v58 = vpop.f32.mrf.mxu0 }
 0xc8e   : > { %v1828_v43 = vadd.f32 %v1827_v58, %v1706_v57 }
 0xc8f   : > { %v1829_v59 = vpop.f32.mrf.mxu0 }
 0xc90   : > { %v1830_v40 = vadd.f32 %v1829_v59, %v1710_v56  ;;  %v1836_v4 = vmax.f32 %v1828_v43, 0.0 }
 0xc91   : > { %v1831_v60 = vpop.f32.mrf.mxu0 }
 0xc92   : > { %v1832_v62 = vadd.f32 %v1831_v60, %v1706_v57  ;;  %v1837_v1 = vmax.f32 %v1830_v40, 0.0  ;;  %v1851_v9 = vmul.f32 %v1844_v5, %v1836_v4 }
 0xc93   : > { %v1833_v63 = vpop.f32.mrf.mxu0 }
 0xc94   : > { %v1838_v15 = vmax.f32 %v1832_v62, 0.0  ;;  %v1834_v3 = vadd.f32 %v1833_v63, %v1710_v56  ;;  %v1852_v7 = vmul.f32 %v1848_v2, %v1837_v1 }
 0xc96   : > { %v1839_v6 = vmax.f32 %v1834_v3, 0.0  ;;  %v1853_v16 = vmul.f32 %v1844_v5, %v1838_v15 }
 0xc98   : > { %v1854_v8 = vmul.f32 %v1848_v2, %v1839_v6  ;;  %v1855_v11 = vpack.c.bf16 %v1853_v16, %v1851_v9 }
 0xc9a   : > { %v1856_v10 = vpack.c.bf16 %v1854_v8, %v1852_v7 }
 0xc9c   : > { %2024 = vmatprep.mubr.bf16.mxu1 %v1856_v10 }
 0xc9d   : > { %2025 = vmatmul.mubr.bf16.vlgmr.msra.gmra.mxu1 %v1855_v11 }
 0xd5d   : > { %v2398_v12 = vpop.f32.mrf.mxu1 }
 0xd5f   : > { %v2399_v27 = vpop.f32.mrf.mxu1 }
 0xd60   : > { %v2400_v14 = vadd.f32 %v2399_v27, %v2398_v12 }
 0xd61   : > { %v2401_v18 = vpop.f32.mrf.mxu1 }
 0xd62   : > { %v2027_v20 = vadd.f32 %v2400_v14, %v2321_v13 }
 0xd63   : > { %v2402_v22 = vpop.f32.mrf.mxu1 }
 0xd64   : > { %v2403_v26 = vadd.f32 %v2402_v22, %v2401_v18  ;;  %v2033_v29 = vadd.f32 %v2027_v20, %v1674_v45 }
 0xd66   : > { %v2030_v55 = vadd.f32 %v2403_v26, %v2321_v13  ;;  %2035 = vadd.xlane.f32.xlu1 %v2033_v29 }
 0xd68   : > { %v2034_v30 = vadd.f32 %v2030_v55, %v1675_v19 }
 0xd6a   : > { %2037 = vadd.xlane.f32.xlu0 %v2034_v30 }
 0xdef   : > { %v2036_v32 = vpop.xlane.xlu1 %2035 }
 0xdf0   : > { %v2039_v31 = vmul.f32 0.0078125, %v2036_v32 }
 0xdf2   : > { %v2041_v33 = vsub.f32 %v2033_v29, %v2039_v31 }
 0xdf3   : > { %v2038_v25 = vpop.xlane.xlu0 %2037 }
 0xdf4   : > { %v2040_v28 = vmul.f32 0.0078125, %v2038_v25  ;;  %v2043_v34 = vmul.f32 %v2041_v33, %v2041_v33 }
 0xdf6   : > { %v2042_v35 = vsub.f32 %v2034_v30, %v2040_v28  ;;  %2045 = vadd.xlane.f32.xlu0 %v2043_v34 }
 0xdf8   : > { %v2044_v36 = vmul.f32 %v2042_v35, %v2042_v35 }
 0xdfa   : > { %2047 = vadd.xlane.f32.xlu0 %v2044_v36 }
 0xe7f   : > { %v2046_v37 = vpop.xlane.xlu0 %2045 }
 0xe80   : > { %v2049_v38 = vmul.f32 0.0078125, %v2046_v37 }
 0xe82   : > { %v2051_v39 = vadd.f32 1e-05, %v2049_v38 }
 0xe83   : > { %v2048_v41 = vpop.xlane.xlu0 %2047 }
 0xe84   : > { %2756 = vrsqrt.f32 %v2051_v39  ;;  %v2050_v42 = vmul.f32 0.0078125, %v2048_v41 }
 0xe86   : > { %v2052_v44 = vadd.f32 1e-05, %v2050_v42 }
 0xe88   : > { %2758 = vrsqrt.f32 %v2052_v44 }
 0xe91   : > { %v2757_v45 = vpop.eup %2756 }
 0xe92   : > { %v2055_v46 = vmul.f32 %v2757_v45, %v2041_v33 }
 0xe94   : > { %2057 = vst [vmem:[%s614_s4] sm:$0xff] %v2055_v46 }
 0xe95   : > { %v2759_v17 = vpop.eup %2758 }
 0xe96   : > { %v2056_v19 = vmul.f32 %v2759_v17, %v2042_v35 }
 0xe98   : > { %2058 = vst [vmem:[%s614_s4 + $0x8] sm:$0xff] %v2056_v19 }
 0xe99   : > { %3011 = shalt.err (!%p3008_p7)
}
 0xe9a   : > { %s3012_s28 = scalar_lea.hbm %s3615_s22, 256  ;;  %s3016_s27 = scalar_lea.hbm %s3724_s8, 512 }
 0xe9b   : > { %p3013_p12 = scmp.ne.s32.totalorder %s3615_s22, %s3012_s28  ;;  %p3017_p3 = scmp.lt.s32.totalorder %s3615_s22, %s3724_s8 }
 0xe9c   : > { %p3018_p4 = scmp.lt.s32.totalorder %s3016_s27, %s3012_s28 }
 0xe9d   : > { %p3014_p13 = pnand %p3013_p12, %p3725_p11 }
 0xe9e   : > { %p3019_p8 = por %p3018_p4, %p3017_p3 }
 0xe9f   : > { %p3015_p0 = pneg %p3014_p13 }
 0xea1   : > { %p3020_p9 = pnand %p3019_p8, %p3015_p0 }
 0xea3   : > { %3023 = shalt.err (!%p3020_p9)
}
 0xea4   : > { %s3106_s0 = smov 128   ;;  %s3107_s4 = smov 8  }
 0xea5   : > { %2536 = dma.vmem_to_hbm [thread:$0]  (%p3725_p11), %s3617_s20, 256, %s3615_s22, %s2060_s10, %s3106_s0, %s3106_s0, %s3107_s4  }
 0xea6 PF: > { %s2088_s23 = sand.u32 1, %s3070_s29   ;;  %p3726_p6 = scmp.ne.s32.totalorder %s3707_s21, 0 }
 0xea7   : > { %p3727_p2 = scmp.ge.s32.totalorder %s3082_s16, 2  ;;  %s2089_s3 = scalar_lea.sflag [#allocation4], %s2088_s23 }
 0xea9   : > { %p2568_p10 = pnand %p3727_p2, %p3726_p6 }
 0xeab   : > { %p2569_p1 = pneg %p2568_p10 }
 0xead   : > { %3065 = dma.done.wait (%p2569_p1), %s2089_s3, 256  }
 0xeae   : > { %3067 = vsyncadd (%p2569_p1), %s2089_s3, 4294967040  ;;  %s3728_s14 = sld [smem:[#allocation25_spill]]  ;;  %p33_p5 = scmp.ge.s32.totalorder %s3289_s25, 4  }
 0xeaf   : > { %s3729_s15 = sld [smem:[#allocation26_spill]]  ;;  %s3730_s29 = smov %s3074_s30 }
 0xeb0   : > { %s3732_s16 = smov %s3289_s25  ;;  %35 = sbr.rel (!%p33_p5) target bundleno = 20 (0x14), region = 162 }
 0xeb4   : > { %s3731_s30 = smov %s3728_s14 }
 0xeb5   :  { %2094 = vsyncpa [#allocation3], 1 }
 0xeb6   :  { %2096 = vsyncpa [#allocation3 + $0x1], 1 }
 0xeb7   :  { %2097 = vsyncpa [#allocation6], 1 }
 0xeb8   :  { %2099 = vsyncpa [#allocation6 + $0x1], 1 }
 0xeb9   :  { %2100 = vsyncpa [#allocation9], 1 }
 0xeba   :  { %2101 = vsyncpa [#allocation12], 1 }
 0xebb   :  { %2102 = vsyncpa [#allocation15], 1 }
 0xebc   :  { %2103 = vsyncpa [#allocation4], 1 }
 0xebd   :  { %2105 = vsyncpa [#allocation4 + $0x1], 1 }

</bundles_post_ra>
